<compile_context>
chip_gen: v5e
topology: v5e:2x2
jax: 0.10.0
libtpu: 0.0.40
codegen_flags: <defaults>
</compile_context>

<pallas_src>
import functools

import jax
import jax.numpy as jnp
from jax.experimental import pallas as pl
from jax.experimental.pallas import tpu as pltpu


def _round_up(x, m):
    return ((x + m - 1) // m) * m


def _vmem_capacity_bytes():
    try:
        info = pltpu.get_tpu_info()
        cap = getattr(info, "vmem_capacity_bytes", None)
        if cap:
            return int(cap)
    except Exception:
        pass
    return 64 * 1024 * 1024            # conservative (v7x-sized) fallback


def _gcn_kernel_rel(adj_ref, h_ref, r_ref, wt_ref, b_ref, out_ref,
                    acc_ref, deg_ref, *, sub, nsub):
    k = pl.program_id(1)

    @pl.when(k == 0)
    def _init():
        acc_ref[...] = jnp.zeros_like(acc_ref)
        deg_ref[...] = jnp.zeros_like(deg_ref)

    adj = adj_ref[...]                                   # (td, ts)   0/1, caller dtype
    h = h_ref[...]                                       # (ts, Fin)  caller dtype

    # MXU: neighbor-sum of node features (native bf16 when caller streams bf16).
    part = jnp.dot(adj, h, preferred_element_type=jnp.float32)
    # In-degree: XLU lane reduce, hides under the r stream.
    deg_ref[...] += jnp.sum(adj.astype(jnp.float32), axis=1, keepdims=True)

    # Relation term: sum_s adj[d,s] * r[d,s,:], processed in 128-wide src sub-chunks
    # so no full (td, ts, Fin) f32 temporary is ever live.  jnp.where (a select)
    # masks ragged-boundary garbage in unpadded r — NaN/Inf cannot propagate.
    for c in range(nsub):
        a = adj[:, c * sub:(c + 1) * sub]                # (td, sub)
        rc = r_ref[:, pl.ds(c * sub, sub), :]            # (td, sub, Fin) from VMEM ref
        m = jnp.where(a[:, :, None] != 0, rc, jnp.zeros_like(rc))
        part = part + jnp.sum(m.astype(jnp.float32), axis=1)
    acc_ref[...] += part

    @pl.when(k == pl.num_programs(1) - 1)
    def _finalize():
        deg = deg_ref[...]                               # (td, 1) f32
        # Exact mean; isolated (or padded) dst rows have acc == 0 and deg == 0 -> ft = 0.
        ft = acc_ref[...] * (1.0 / jnp.maximum(deg, 1.0))
        out = jnp.dot(ft, wt_ref[...], preferred_element_type=jnp.float32) + b_ref[...]
        out_ref[...] = out.astype(out_ref.dtype)


def _gcn_kernel_norel(adj_ref, h_ref, wt_ref, b_ref, out_ref,
                      acc_ref, deg_ref, *, ts, h_resident):
    k = pl.program_id(1)

    @pl.when(k == 0)
    def _init():
        acc_ref[...] = jnp.zeros_like(acc_ref)
        deg_ref[...] = jnp.zeros_like(deg_ref)

    adj = adj_ref[...]                                   # (td, ts)
    if h_resident:
        # h is a grid-invariant (Ns, Fin) VMEM block: fetched once, sliced per step.
        s0 = pl.multiple_of(k * ts, ts)
        h = h_ref[pl.ds(s0, ts), :]
    else:
        h = h_ref[...]
    acc_ref[...] += jnp.dot(adj, h, preferred_element_type=jnp.float32)
    deg_ref[...] += jnp.sum(adj.astype(jnp.float32), axis=1, keepdims=True)

    @pl.when(k == pl.num_programs(1) - 1)
    def _finalize():
        deg = deg_ref[...]
        ft = acc_ref[...] * (1.0 / jnp.maximum(deg, 1.0))
        out = jnp.dot(ft, wt_ref[...], preferred_element_type=jnp.float32) + b_ref[...]
        out_ref[...] = out.astype(out_ref.dtype)


def gcn_layer(adj, h, r, W, b, *, pool_rel=True, td=None, ts=None,
              vmem_limit_bytes=None):
    """Pallas GCN layer.

    adj:[N,N] (adj[dst,src], 0/1), h:[N,Fin], r:[N,N,Fin] (ignored if pool_rel=False),
    W:[Fout,Fin], b:[Fout].  adj/h/r may be float32 or bfloat16 and are streamed as-is
    (bf16 recommended for the rel path: halves HBM bytes of r, native bf16 MXU).
    Accumulation is always f32.  Returns [N, Fout] float32.
    """
    N, Fin = h.shape
    Fout = W.shape[0]
    Fop = _round_up(Fout, 128)

    # ---- generation-aware VMEM budgets ------------------------------------
    phys_vmem = _vmem_capacity_bytes()
    if vmem_limit_bytes is None:
        vmem_limit_bytes = min(int(phys_vmem * 0.82), 110 * 1024 * 1024)
    big_vmem = phys_vmem >= 100 * 1024 * 1024            # v5e/v6e (128 MiB) vs v7x (64 MiB)

    # ---- tile sizes ---------------------------------------------------------
    # src tile = lane axis of adj -> multiple of 128, no larger than N rounded down.
    if ts is None:
        ts = 512
    ts = max(128, min(ts, max(128, (N // 128) * 128)))
    ts = (ts // 128) * 128
    Ns = _round_up(N, ts)

    if td is None:
        if pool_rel:
            r_budget = (48 if big_vmem else 16) * 1024 * 1024   # double-buffered r stream
            r_item = jnp.dtype(r.dtype).itemsize
            td = max(8, r_budget // (2 * ts * Fin * r_item))
        else:
            td = 256
    # >= 2 dst tiles so the "parallel" axis can shard across v7x's 2 TensorCores.
    td = min(td, max(8, _round_up((N + 1) // 2, 8)))
    td = max(8, (td // 8) * 8)
    td = min(td, 512)
    Nd = _round_up(N, td)

    # ---- cheap pads (adj, h, W, b only — never the N^2*Fin relation tensor) ----
    adj_p = adj if (Nd == N and Ns == N) else jnp.pad(adj, ((0, Nd - N), (0, Ns - N)))
    h_p = h if Ns == N else jnp.pad(h, ((0, Ns - N), (0, 0)))
    wt_p = jnp.zeros((Fin, Fop), jnp.float32).at[:, :Fout].set(W.T.astype(jnp.float32))
    b_p = jnp.zeros((1, Fop), jnp.float32).at[0, :Fout].set(b.astype(jnp.float32))

    grid = (Nd // td, Ns // ts)
    out_shape = jax.ShapeDtypeStruct((Nd, Fop), jnp.float32)

    adj_spec = pl.BlockSpec((td, ts), lambda i, k: (i, k))
    wt_spec = pl.BlockSpec((Fin, Fop), lambda i, k: (0, 0))    # grid-invariant, fetched once
    b_spec = pl.BlockSpec((1, Fop), lambda i, k: (0, 0))
    out_spec = pl.BlockSpec((td, Fop), lambda i, k: (i, 0))    # resident across the reduction
    scratch = [pltpu.VMEM((td, Fin), jnp.float32),             # f32 feature accumulator
               pltpu.VMEM((td, 1), jnp.float32)]               # f32 in-degree accumulator
    cparams = pltpu.CompilerParams(
        dimension_semantics=("parallel", "arbitrary"),
        vmem_limit_bytes=vmem_limit_bytes,
    )

    if pool_rel:
        # Only tiny graphs (a single tile over-covers the node axis) pad r; otherwise
        # r is streamed unpadded and ragged boundary tiles are masked in-kernel.
        if td > N or ts > N:
            r_in = jnp.pad(r, ((0, Nd - N), (0, Ns - N), (0, 0)))
        else:
            r_in = r
        h_spec = pl.BlockSpec((ts, Fin), lambda i, k: (k, 0))
        # NOTE: r_spec is the single large per-step DMA; pipeline_mode=pl.Buffered(3)
        # is worth a sweep once near the HBM roofline.
        r_spec = pl.BlockSpec((td, ts, Fin), lambda i, k: (i, k, 0))
        sub = 128
        kern = functools.partial(_gcn_kernel_rel, sub=sub, nsub=ts // sub)
        out = pl.pallas_call(
            kern,
            out_shape=out_shape,
            grid=grid,
            in_specs=[adj_spec, h_spec, r_spec, wt_spec, b_spec],
            out_specs=out_spec,
            scratch_shapes=scratch,
            compiler_params=cparams,
        )(adj_p, h_p, r_in, wt_p, b_p)
    else:
        # Hold h resident in VMEM (grid-invariant block) when it fits; otherwise stream.
        h_resident = Ns * Fin * jnp.dtype(h.dtype).itemsize <= 24 * 1024 * 1024
        if h_resident:
            h_spec = pl.BlockSpec((Ns, Fin), lambda i, k: (0, 0))
        else:
            h_spec = pl.BlockSpec((ts, Fin), lambda i, k: (k, 0))
        kern = functools.partial(_gcn_kernel_norel, ts=ts, h_resident=h_resident)
        out = pl.pallas_call(
            kern,
            out_shape=out_shape,
            grid=grid,
            in_specs=[adj_spec, h_spec, wt_spec, b_spec],
            out_specs=out_spec,
            scratch_shapes=scratch,
            compiler_params=cparams,
        )(adj_p, h_p, wt_p, b_p)

    return out[:N, :Fout]


def gcn_reference(adj, h, r, W, b, *, pool_rel=True):
    agg = adj @ h
    if pool_rel:
        agg = agg + jnp.sum(adj[:, :, None] * r, axis=1)
    deg = jnp.sum(adj, axis=1, keepdims=True)
    ft = jnp.where(deg > 0.0, agg / jnp.where(deg > 0.0, deg, 1.0), 0.0)
    return ft @ W.T + b[None, :]


def _make_inputs(key, N, Fin, Fout):
    k_adj, k_h, k_r, k_w, k_b = jax.random.split(key, 5)
    adj = (jax.random.uniform(k_adj, (N, N)) < 0.4).astype(jnp.float32)
    adj = adj.at[0, :].set(0.0)        # node 0 has no in-edges -> ft = 0 (DGL mean convention)
    h = jax.random.normal(k_h, (N, Fin), dtype=jnp.float32)
    r = jax.random.normal(k_r, (N, N, Fin), dtype=jnp.float32)
    bound = 1.0 / (Fin ** 0.5)
    W = jax.random.uniform(k_w, (Fout, Fin), minval=-bound, maxval=bound, dtype=jnp.float32)
    b = jax.random.uniform(k_b, (Fout,), minval=-bound, maxval=bound, dtype=jnp.float32)
    return adj, h, r, W, b


if __name__ == "__main__":
    TOL = 2e-2

    # ---- tiny single-tile case (grid 1x1), both pooling modes ----------------
    adj, h, r, W, b = _make_inputs(jax.random.PRNGKey(0), N=8, Fin=16, Fout=32)
    out = jax.block_until_ready(gcn_layer(adj, h, r, W, b, pool_rel=True))
    ref = gcn_reference(adj, h, r, W, b, pool_rel=True)
    assert out.shape == (8, 32)
    assert jnp.allclose(out, ref, atol=TOL, rtol=TOL), "mismatch vs reference (pool_rel)"

    out2 = jax.block_until_ready(gcn_layer(adj, h, r, W, b, pool_rel=False))
    ref2 = gcn_reference(adj, h, r, W, b, pool_rel=False)
    assert jnp.allclose(out2, ref2, atol=TOL, rtol=TOL), "mismatch vs reference (no rel)"

    # ---- multi-tile case: dst tiling + src-axis accumulation + unpadded ragged r ----
    adj3, h3, r3, W3, b3 = _make_inputs(jax.random.PRNGKey(0), N=160, Fin=96, Fout=64)
    out3 = jax.block_until_ready(gcn_layer(adj3, h3, r3, W3, b3, pool_rel=True))
    ref3 = gcn_reference(adj3, h3, r3, W3, b3, pool_rel=True)
    assert jnp.allclose(out3, ref3, atol=TOL, rtol=TOL), "mismatch vs reference (tiled rel)"

    out3b = jax.block_until_ready(gcn_layer(adj3, h3, r3, W3, b3, pool_rel=False))
    ref3b = gcn_reference(adj3, h3, r3, W3, b3, pool_rel=False)
    assert jnp.allclose(out3b, ref3b, atol=TOL, rtol=TOL), "mismatch vs reference (tiled no-rel)"

    # ---- bf16 streaming path (recommended): half the r bytes, bf16 MXU, f32 accumulate ----
    adj16 = adj3.astype(jnp.bfloat16)
    h16 = h3.astype(jnp.bfloat16)
    r16 = r3.astype(jnp.bfloat16)
    out4 = jax.block_until_ready(gcn_layer(adj16, h16, r16, W3, b3, pool_rel=True))
    ref4 = gcn_reference(adj16.astype(jnp.float32), h16.astype(jnp.float32),
                         r16.astype(jnp.float32), W3, b3, pool_rel=True)
    assert jnp.allclose(out4, ref4, atol=1e-1, rtol=1e-1), "mismatch vs reference (bf16)"

    print("KERNEL_OK")
</pallas_src>

<mosaic_0001>
module attributes {stable_mosaic.version = 11 : i64} {
  func.func @_gcn_kernel_rel(%arg0: i32, %arg1: i32, %arg2: memref<8x128xf32, #tpu.memory_space<vmem>>, %arg3: memref<128x16xf32, #tpu.memory_space<vmem>>, %arg4: memref<8x128x16xf32, #tpu.memory_space<vmem>>, %arg5: memref<16x128xf32, #tpu.memory_space<vmem>>, %arg6: memref<1x128xf32, #tpu.memory_space<vmem>>, %arg7: memref<8x128xf32, #tpu.memory_space<vmem>>, %arg8: memref<8x16xf32, #tpu.memory_space<vmem>>, %arg9: memref<8x1xf32, #tpu.memory_space<vmem>>) attributes {dimension_semantics = [#tpu.dimension_semantics<parallel>, #tpu.dimension_semantics<arbitrary>], iteration_bounds = array<i64: 1, 1>, scalar_prefetch = 0 : i64, scratch_operands = 2 : i64, tpu.core_type = #tpu.core_type<tc>, window_params = [{transform_indices = @transform_0, window_bounds = array<i64: 8, 128>}, {transform_indices = @transform_1, window_bounds = array<i64: 128, 16>}, {transform_indices = @transform_2, window_bounds = array<i64: 8, 128, 16>}, {pipeline_mode = #tpu.pipeline_mode<synchronous>, transform_indices = @transform_3, window_bounds = array<i64: 16, 128>}, {pipeline_mode = #tpu.pipeline_mode<synchronous>, transform_indices = @transform_4, window_bounds = array<i64: 1, 128>}, {transform_indices = @transform_5, window_bounds = array<i64: 8, 128>}]} {
    %c0_i32 = arith.constant 0 : i32
    %0 = arith.cmpi eq, %arg1, %c0_i32 : i32
    %1 = arith.extui %0 : i1 to i32
    %c0_i32_0 = arith.constant 0 : i32
    %2 = arith.cmpi ne, %1, %c0_i32_0 : i32
    scf.if %2 {
      %cst_21 = arith.constant 0.000000e+00 : f32
      %27 = vector.broadcast %cst_21 : f32 to vector<8x16xf32>
      %c0_22 = arith.constant 0 : index
      %c0_23 = arith.constant 0 : index
      %28 = vector.load %arg8[%c0_22, %c0_23] : memref<8x16xf32, #tpu.memory_space<vmem>>, vector<8x16xf32>
      tpu.vector_store %arg8[%c0_22, %c0_23], %27 {strides = array<i32>} : memref<8x16xf32, #tpu.memory_space<vmem>>, vector<8x16xf32>,
      %cst_24 = arith.constant 0.000000e+00 : f32
      %29 = vector.broadcast %cst_24 : f32 to vector<8x1xf32>
      %c0_25 = arith.constant 0 : index
      %c0_26 = arith.constant 0 : index
      %30 = vector.load %arg9[%c0_25, %c0_26] : memref<8x1xf32, #tpu.memory_space<vmem>>, vector<8x1xf32>
      tpu.vector_store %arg9[%c0_25, %c0_26], %29 {strides = array<i32>} : memref<8x1xf32, #tpu.memory_space<vmem>>, vector<8x1xf32>,
    } else {
    }
    %c0 = arith.constant 0 : index
    %c0_1 = arith.constant 0 : index
    %3 = vector.load %arg2[%c0, %c0_1] : memref<8x128xf32, #tpu.memory_space<vmem>>, vector<8x128xf32>
    %c0_2 = arith.constant 0 : index
    %c0_3 = arith.constant 0 : index
    %4 = vector.load %arg3[%c0_2, %c0_3] : memref<128x16xf32, #tpu.memory_space<vmem>>, vector<128x16xf32>
    %cst = arith.constant dense<0.000000e+00> : vector<8x16xf32>
    %5 = tpu.matmul %3, %4, %cst {dimension_numbers = #tpu.dot_dimension_numbers<[1], [0], [0], [1], [0, 0, 1, 1], [], []>} : vector<8x128xf32>, vector<128x16xf32>, vector<8x16xf32> -> vector<8x16xf32>
    %c0_4 = arith.constant 0 : index
    %c0_5 = arith.constant 0 : index
    %6 = vector.load %arg9[%c0_4, %c0_5] : memref<8x1xf32, #tpu.memory_space<vmem>>, vector<8x1xf32>
    %cst_6 = arith.constant dense<0.000000e+00> : vector<8xf32>
    %7 = vector.multi_reduction <add>, %3, %cst_6 [1] : vector<8x128xf32> to vector<8xf32>
    %8 = vector.shape_cast %7 : vector<8xf32> to vector<8x1xf32>
    %9 = arith.addf %6, %8 : vector<8x1xf32>
    %c0_7 = arith.constant 0 : index
    %c0_8 = arith.constant 0 : index
    %10 = vector.load %arg9[%c0_7, %c0_8] : memref<8x1xf32, #tpu.memory_space<vmem>>, vector<8x1xf32>
    tpu.vector_store %arg9[%c0_7, %c0_8], %9 {strides = array<i32>} : memref<8x1xf32, #tpu.memory_space<vmem>>, vector<8x1xf32>,
    %c0_9 = arith.constant 0 : index
    %c0_10 = arith.constant 0 : index
    %c0_11 = arith.constant 0 : index
    %11 = vector.load %arg4[%c0_9, %c0_10, %c0_11] : memref<8x128x16xf32, #tpu.memory_space<vmem>>, vector<8x128x16xf32>
    %12 = vector.shape_cast %3 : vector<8x128xf32> to vector<8x128x1xf32>
    %cst_12 = arith.constant 0.000000e+00 : f32
    %13 = vector.broadcast %cst_12 : f32 to vector<8x128x1xf32>
    %14 = arith.cmpf one, %12, %13 : vector<8x128x1xf32>
    %cst_13 = arith.constant 0.000000e+00 : f32
    %15 = vector.broadcast %cst_13 : f32 to vector<8x128x16xf32>
    %16 = vector.shape_cast %14 : vector<8x128x1xi1> to vector<8x128x1xi1>
    %17 = vector.broadcast %16 : vector<8x128x1xi1> to vector<8x128x16xi1>
    %18 = arith.select %17, %11, %15 : vector<8x128x16xi1>, vector<8x128x16xf32>
    %cst_14 = arith.constant dense<0.000000e+00> : vector<8x16xf32>
    %19 = vector.multi_reduction <add>, %18, %cst_14 [1] : vector<8x128x16xf32> to vector<8x16xf32>
    %20 = arith.addf %5, %19 : vector<8x16xf32>
    %c0_15 = arith.constant 0 : index
    %c0_16 = arith.constant 0 : index
    %21 = vector.load %arg8[%c0_15, %c0_16] : memref<8x16xf32, #tpu.memory_space<vmem>>, vector<8x16xf32>
    %22 = arith.addf %21, %20 : vector<8x16xf32>
    %c0_17 = arith.constant 0 : index
    %c0_18 = arith.constant 0 : index
    %23 = vector.load %arg8[%c0_17, %c0_18] : memref<8x16xf32, #tpu.memory_space<vmem>>, vector<8x16xf32>
    tpu.vector_store %arg8[%c0_17, %c0_18], %22 {strides = array<i32>} : memref<8x16xf32, #tpu.memory_space<vmem>>, vector<8x16xf32>,
    %c0_i32_19 = arith.constant 0 : i32
    %24 = arith.cmpi eq, %arg1, %c0_i32_19 : i32
    %25 = arith.extui %24 : i1 to i32
    %c0_i32_20 = arith.constant 0 : i32
    %26 = arith.cmpi ne, %25, %c0_i32_20 : i32
    scf.if %26 {
      %c0_21 = arith.constant 0 : index
      %c0_22 = arith.constant 0 : index
      %27 = vector.load %arg9[%c0_21, %c0_22] : memref<8x1xf32, #tpu.memory_space<vmem>>, vector<8x1xf32>
      %c0_23 = arith.constant 0 : index
      %c0_24 = arith.constant 0 : index
      %28 = vector.load %arg8[%c0_23, %c0_24] : memref<8x16xf32, #tpu.memory_space<vmem>>, vector<8x16xf32>
      %cst_25 = arith.constant 1.000000e+00 : f32
      %29 = vector.broadcast %cst_25 : f32 to vector<8x1xf32>
      %30 = arith.maximumf %27, %29 : vector<8x1xf32>
      %cst_26 = arith.constant 1.000000e+00 : f32
      %31 = vector.broadcast %cst_26 : f32 to vector<8x1xf32>
      %32 = arith.divf %31, %30 : vector<8x1xf32>
      %33 = vector.broadcast %32 : vector<8x1xf32> to vector<8x16xf32>
      %34 = arith.mulf %28, %33 : vector<8x16xf32>
      %c0_27 = arith.constant 0 : index
      %c0_28 = arith.constant 0 : index
      %35 = vector.load %arg5[%c0_27, %c0_28] : memref<16x128xf32, #tpu.memory_space<vmem>>, vector<16x128xf32>
      %cst_29 = arith.constant dense<0.000000e+00> : vector<8x128xf32>
      %36 = tpu.matmul %34, %35, %cst_29 {dimension_numbers = #tpu.dot_dimension_numbers<[1], [0], [0], [1], [0, 0, 1, 1], [], []>} : vector<8x16xf32>, vector<16x128xf32>, vector<8x128xf32> -> vector<8x128xf32>
      %c0_30 = arith.constant 0 : index
      %c0_31 = arith.constant 0 : index
      %37 = vector.load %arg6[%c0_30, %c0_31] : memref<1x128xf32, #tpu.memory_space<vmem>>, vector<1x128xf32>
      %38 = vector.broadcast %37 : vector<1x128xf32> to vector<8x128xf32>
      %39 = arith.addf %36, %38 : vector<8x128xf32>
      %c0_32 = arith.constant 0 : index
      %c0_33 = arith.constant 0 : index
      %40 = vector.load %arg7[%c0_32, %c0_33] : memref<8x128xf32, #tpu.memory_space<vmem>>, vector<8x128xf32>
      tpu.vector_store %arg7[%c0_32, %c0_33], %39 {strides = array<i32>} : memref<8x128xf32, #tpu.memory_space<vmem>>, vector<8x128xf32>,
    } else {
    }
    return
  }
  func.func @transform_0(%arg0: i32, %arg1: i32) -> (i32, i32) {
    %c0_i32 = arith.constant 0 : i32
    return %arg0, %arg1 : i32, i32
  }
  func.func @transform_1(%arg0: i32, %arg1: i32) -> (i32, i32) {
    %c0_i32 = arith.constant 0 : i32
    %c0_i32_0 = arith.constant 0 : i32
    return %arg1, %c0_i32 : i32, i32
  }
  func.func @transform_2(%arg0: i32, %arg1: i32) -> (i32, i32, i32) {
    %c0_i32 = arith.constant 0 : i32
    %c0_i32_0 = arith.constant 0 : i32
    return %arg0, %arg1, %c0_i32 : i32, i32, i32
  }
  func.func @transform_3(%arg0: i32, %arg1: i32) -> (i32, i32) {
    %c0_i32 = arith.constant 0 : i32
    %c0_i32_0 = arith.constant 0 : i32
    %c0_i32_1 = arith.constant 0 : i32
    return %c0_i32, %c0_i32_0 : i32, i32
  }
  func.func @transform_4(%arg0: i32, %arg1: i32) -> (i32, i32) {
    %c0_i32 = arith.constant 0 : i32
    %c0_i32_0 = arith.constant 0 : i32
    %c0_i32_1 = arith.constant 0 : i32
    return %c0_i32, %c0_i32_0 : i32, i32
  }
  func.func @transform_5(%arg0: i32, %arg1: i32) -> (i32, i32) {
    %c0_i32 = arith.constant 0 : i32
    %c0_i32_0 = arith.constant 0 : i32
    return %arg0, %c0_i32 : i32, i32
  }
}

</mosaic_0001>

<bundles_post_ra>
// kernel: tpu_custom_call.1
= control target key start
LH: loop header
LB: loop body
LE: loop exit
PB: predicated region body
PF: predicated region fallthrough
CT: control target
= control target key end

     0   :  { %v181_v1 = vlaneseq  ;;  %s3114_s0 = inlined_call_operand.vmem [shape: f32[8,128], index: 0, kind: input, shape index: {}]   ;;  %s3115_s1 = inlined_call_operand.vmem [shape: f32[128,16], index: 1, kind: input, shape index: {}]   ;;  %s3116_s2 = inlined_call_operand.vmem [shape: f32[8,128,16], index: 2, kind: input, shape index: {}]   ;;  %s3117_s3 = inlined_call_operand.vmem [shape: f32[16,128], index: 3, kind: input, shape index: {}]   ;;  %s3118_s4 = inlined_call_operand.vmem [shape: f32[1,128], index: 4, kind: input, shape index: {}]   ;;  %s3119_s5 = inlined_call_operand.hbm [shape: f32[8,128], index: 5, kind: output, shape index: {}]  }
   0x1   :  { %v2071_v0 = vld [vmem:[%s3114_s0] sm:$0xff] }
   0x2   :  { %10 = vsyncpa [#allocation5], 0  ;;  %47 = vadd.xlane.f32.xlu0 %v2071_v0  ;;  %v2074_v2 = vshrl.u32 %v181_v1, 7  ;;  %v2089_v6 = vperm.slane %v2071_v0, 0  ;;  %v2094_v7 = vperm.slane %v2071_v0, 1  ;;  %v2133_v14 = vperm.slane %v2071_v0, 2 }
   0x3   :  { %v2157_v18 = vperm.slane %v2071_v0, 3  ;;  %v2178_v21 = vperm.slane %v2071_v0, 4  ;;  %vm27_vm0 = vcmask 7168   ;;  %vm25_vm1 = vcmask 130048   ;;  %v69_v50 = vld [vmem:[%s3116_s2 + $0x88] sm:$0xff]  ;;  %v70_v51 = vld [vmem:[%s3116_s2 + $0x90] sm:$0xff] }
   0x4   :  { %v2077_v3 = vadd.s32 24, %v2074_v2  ;;  %v2080_v4 = vadd.s32 8, %v2074_v2  ;;  %v2083_v5 = vadd.s32 16, %v2074_v2  ;;  %v2097_v8 = vadd.s32 32, %v2074_v2  ;;  %v68_v54 = vld [vmem:[%s3116_s2 + $0x80] sm:$0xff]  ;;  %s2037_s8 = smov [#allocation4]  }
   0x5   :  { %v2103_v9 = vadd.s32 56, %v2074_v2  ;;  %v2109_v10 = vadd.s32 48, %v2074_v2  ;;  %v2112_v11 = vadd.s32 40, %v2074_v2  ;;  %v2118_v12 = vadd.s32 96, %v2074_v2  ;;  %v72_v1 = vld [vmem:[%s3116_s2 + $0xa0] sm:$0xff]  ;;  %s1873_s9 = sshll.u32 %s2037_s8, 4  ;;  %s1874_s9 = int_to_ptr.vmem [resolvable:$true] %s1873_s9 }
   0x6   :  { %1890 = vset.pattern.permute.xlu2 %v2077_v3  ;;  %1888 = vset.pattern.permute.xlu1 %v2080_v4  ;;  %v2124_v13 = vadd.s32 64, %v2074_v2  ;;  %v2136_v15 = vadd.s32 80, %v2074_v2  ;;  %v2139_v16 = vadd.s32 72, %v2074_v2  ;;  %v2145_v17 = vadd.s32 88, %v2074_v2  ;;  %s1875_s12 = sshll.u32 %s3119_s5, 4  ;;  %s1876_s12 = int_to_ptr.hbm [resolvable:$true] %s1875_s12 }
   0x7   :  { %1904 = vset.pattern.permute.xlu0 %v2083_v5  ;;  %v2160_v19 = vadd.s32 120, %v2074_v2  ;;  %v2163_v20 = vadd.s32 112, %v2074_v2  ;;  %v2035_v22 = vmov 0.0   ;;  %v2202_v27 = vperm.slane %v2071_v0, 7 }
   0x8   :  { %28 = vst.msk [vmem:[#allocation3] sm:$0xff] %vm27_vm0, %v2035_v22  ;;  %v2217_v32 = vperm.slane %v2071_v0, 5  ;;  %v2222_v34 = vadd.s32 104, %v2074_v2  ;;  %v2255_v44 = vperm.slane %v2071_v0, 6 }
   0x9   :  { %26 = vst.msk [vmem:[#allocation2] sm:$0xff] %vm25_vm1, %v2035_v22 }
   0xe   :  { %203 = vperm.xlu2 %1890, %v2089_v6   ;;  %191 = vperm.xlu1 %1888, %v2089_v6  }
   0xf   :  { %v46_v24 = vld [vmem:[#allocation3] sm:$0xff] }
  0x16   :  { %294 = vperm.xlu0 %1904, %v2094_v7   ;;  %1891 = vset.pattern.permute.xlu2 %v2097_v8 }
  0x17   :  { %1889 = vset.pattern.permute.xlu1 %v2083_v5 }
  0x1e   :  { %1909 = vset.pattern.permute.xlu0 %v2103_v9  ;;  %209 = vperm.xlu2 %1891, %v2089_v6  }
  0x1f   :  { %197 = vperm.xlu1 %1889, %v2089_v6  }
  0x26   :  { %324 = vperm.xlu0 %1909, %v2094_v7   ;;  %1893 = vset.pattern.permute.xlu2 %v2109_v10 }
  0x27   :  { %1892 = vset.pattern.permute.xlu1 %v2112_v11 }
  0x2e   :  { %1914 = vset.pattern.permute.xlu0 %v2118_v12  ;;  %221 = vperm.xlu2 %1893, %v2089_v6  }
  0x2f   :  { %215 = vperm.xlu1 %1892, %v2089_v6  }
  0x36   :  { %354 = vperm.xlu0 %1914, %v2094_v7   ;;  %1895 = vset.pattern.permute.xlu2 %v2124_v13 }
  0x37   :  { %1894 = vset.pattern.permute.xlu1 %v2103_v9 }
  0x3e   :  { %1919 = vset.pattern.permute.xlu0 %v2080_v4  ;;  %233 = vperm.xlu2 %1895, %v2089_v6  }
  0x3f   :  { %227 = vperm.xlu1 %1894, %v2089_v6  }
  0x46   :  { %385 = vperm.xlu0 %1919, %v2133_v14   ;;  %1897 = vset.pattern.permute.xlu2 %v2136_v15 }
  0x47   :  { %1896 = vset.pattern.permute.xlu1 %v2139_v16 }
  0x4e   :  { %1928 = vset.pattern.permute.xlu0 %v2145_v17  ;;  %245 = vperm.xlu2 %1897, %v2089_v6  }
  0x4f   :  { %239 = vperm.xlu1 %1896, %v2089_v6  }
  0x56   :  { %445 = vperm.xlu0 %1928, %v2133_v14   ;;  %1899 = vset.pattern.permute.xlu2 %v2118_v12 }
  0x57   :  { %1898 = vset.pattern.permute.xlu1 %v2145_v17 }
  0x5e   :  { %1937 = vset.pattern.permute.xlu0 %v2112_v11  ;;  %257 = vperm.xlu2 %1899, %v2089_v6  }
  0x5f   :  { %251 = vperm.xlu1 %1898, %v2089_v6  }
  0x66   :  { %506 = vperm.xlu0 %1937, %v2157_v18   ;;  %1901 = vset.pattern.permute.xlu2 %v2160_v19 }
  0x67   :  { %1900 = vset.pattern.permute.xlu1 %v2163_v20 }
  0x68   :  { %v2199_v25 = vpop.permute.xlu2 %203 }
  0x69   :  { %vm959_vm12 = vcmp.ne.f32.partialorder %v2199_v25, 0.0  ;;  %v57_v25 = vld [vmem:[%s3116_s2 + $0x28] sm:$0xff] }
  0x6e   :  { %1946 = vset.pattern.permute.xlu0 %v2160_v19  ;;  %275 = vperm.xlu2 %1901, %v2089_v6  }
  0x6f   :  { %269 = vperm.xlu1 %1900, %v2089_v6  }
  0x75   :  { %v48_v23 = vpop.xlane.xlu0 %47 }
  0x76   :  { %566 = vperm.xlu0 %1946, %v2157_v18   ;;  %1903 = vset.pattern.permute.xlu2 %v2080_v4  ;;  %v49_v26 = vadd.f32 %v48_v23, %v46_v24 }
  0x77   :  { %1902 = vset.pattern.permute.xlu1 %v2074_v2 }
  0x78   :  { %51 = vst.msk [vmem:[#allocation3] sm:$0xff] %vm27_vm0, %v49_v26  ;;  %v2207_v28 = vpop.permute.xlu2 %209 }
  0x79   :  { %vm960_vm14 = vcmp.ne.f32.partialorder %v2207_v28, 0.0  ;;  %v58_v28 = vld [vmem:[%s3116_s2 + $0x30] sm:$0xff] }
  0x7e   :  { %1951 = vset.pattern.permute.xlu0 %v2097_v8  ;;  %288 = vperm.xlu2 %1903, %v2094_v7  }
  0x7f   :  { %282 = vperm.xlu1 %1902, %v2094_v7  }
  0x80   :  { %v2209_v29 = vpop.permute.xlu1 %191 }
  0x81   :  { %vm957_vm10 = vcmp.ne.f32.partialorder %v2209_v29, 0.0 }
  0x86   :  { %597 = vperm.xlu0 %1951, %v2178_v21   ;;  %1906 = vset.pattern.permute.xlu2 %v2097_v8 }
  0x87   :  { %1905 = vset.pattern.permute.xlu1 %v2077_v3 }
  0x88   :  { %v295_v30 = vpop.permute.xlu0 %294  ;;  %v2214_v31 = vpop.permute.xlu2 %221 }
  0x89   :  { %vm974_vm3 = vcmp.ne.f32.partialorder %v295_v30, 0.0  ;;  %vm962_vm0 = vcmp.ne.f32.partialorder %v2214_v31, 0.0  ;;  %v76_v31 = vld [vmem:[%s3116_s2 + $0xc0] sm:$0xff] }
  0x8a   :  { %v1358_v55 = vsel %vm974_vm3, %v70_v51, 0.0 }
  0x8b   :  { %v1509_v59 = vsel %vm25_vm1, %v1358_v55, 0.0  ;;  %v74_v55 = vld [vmem:[%s3116_s2 + $0xb0] sm:$0xff] }
  0x8e   :  { %1956 = vset.pattern.permute.xlu0 %v2139_v16  ;;  %306 = vperm.xlu2 %1906, %v2094_v7  }
  0x8f   :  { %300 = vperm.xlu1 %1905, %v2094_v7  }
  0x91   :  { %v2219_v33 = vpop.permute.xlu1 %197 }
  0x92   :  { %vm958_vm11 = vcmp.ne.f32.partialorder %v2219_v33, 0.0 }
  0x96   :  { %627 = vperm.xlu0 %1956, %v2178_v21   ;;  %1908 = vset.pattern.permute.xlu2 %v2109_v10 }
  0x97   :  { %1907 = vset.pattern.permute.xlu1 %v2112_v11 }
  0x98   :  { %v2227_v35 = vpop.permute.xlu0 %324  ;;  %v2229_v36 = vpop.permute.xlu2 %233 }
  0x99   :  { %vm979_vm8 = vcmp.ne.f32.partialorder %v2227_v35, 0.0 }
  0x9e   :  { %1957 = vset.pattern.permute.xlu0 %v2074_v2  ;;  %318 = vperm.xlu2 %1908, %v2094_v7  }
  0x9f   :  { %312 = vperm.xlu1 %1907, %v2094_v7  }
  0xa1   :  { %v2231_v37 = vpop.permute.xlu1 %215 }
  0xa2   :  { %vm961_vm15 = vcmp.ne.f32.partialorder %v2231_v37, 0.0 }
  0xa6   :  { %185 = vperm.xlu0 %1957, %v2089_v6   ;;  %1911 = vset.pattern.permute.xlu2 %v2139_v16 }
  0xa7   :  { %1910 = vset.pattern.permute.xlu1 %v2124_v13 }
  0xa8   :  { %v2236_v38 = vpop.permute.xlu2 %245  ;;  %v2240_v40 = vpop.permute.xlu0 %354 }
  0xae   :  { %476 = vperm.xlu0 %1957, %v2157_v18   ;;  %336 = vperm.xlu2 %1911, %v2094_v7  }
  0xaf   :  { %330 = vperm.xlu1 %1910, %v2094_v7  }
  0xb1   :  { %v2238_v39 = vpop.permute.xlu1 %227 }
  0xb2   :  { %vm963_vm3 = vcmp.ne.f32.partialorder %v2238_v39, 0.0 }
  0xb6   :  { %864 = vperm.xlu0 %1957, %v2202_v27   ;;  %1913 = vset.pattern.permute.xlu2 %v2145_v17 }
  0xb7   :  { %1912 = vset.pattern.permute.xlu1 %v2136_v15 }
  0xb8   :  { %v2247_v42 = vpop.permute.xlu2 %257  ;;  %v2249_v43 = vpop.permute.xlu0 %385 }
  0xbe   :  { %1974 = vset.pattern.permute.xlu0 %v2077_v3  ;;  %348 = vperm.xlu2 %1913, %v2094_v7  }
  0xbf   :  { %342 = vperm.xlu1 %1912, %v2094_v7  }
  0xc1   :  { %v2245_v41 = vpop.permute.xlu1 %239 }
  0xc6   :  { %688 = vperm.xlu0 %1974, %v2217_v32   ;;  %1916 = vset.pattern.permute.xlu2 %v2163_v20 }
  0xc7   :  { %1915 = vset.pattern.permute.xlu1 %v2222_v34 }
  0xc8   :  { %v2259_v46 = vpop.permute.xlu2 %275  ;;  %v2262_v47 = vpop.permute.xlu0 %445 }
  0xce   :  { %882 = vperm.xlu0 %1974, %v2202_v27   ;;  %366 = vperm.xlu2 %1916, %v2094_v7  }
  0xcf   :  { %360 = vperm.xlu1 %1915, %v2094_v7  }
  0xd1   :  { %v2257_v45 = vpop.permute.xlu1 %251 }
  0xd6   :  { %1979 = vset.pattern.permute.xlu0 %v2109_v10  ;;  %1918 = vset.pattern.permute.xlu2 %v2074_v2 }
  0xd7   :  { %1917 = vset.pattern.permute.xlu1 %v2160_v19 }
  0xd8   :  { %v289_v49 = vpop.permute.xlu2 %288  ;;  %v2277_v53 = vpop.permute.xlu0 %506 }
  0xd9   :  { %vm973_vm2 = vcmp.ne.f32.partialorder %v289_v49, 0.0 }
  0xda   :  { %v1357_v52 = vsel %vm973_vm2, %v69_v50, 0.0 }
  0xdb   :  { %v1507_v57 = vsel %vm25_vm1, %v1357_v52, 0.0 }
  0xde   :  { %415 = vperm.xlu0 %1979, %v2133_v14   ;;  %379 = vperm.xlu2 %1918, %v2133_v14  }
  0xdf   :  { %372 = vperm.xlu1 %1917, %v2094_v7   ;;  %v71_v7 = vld [vmem:[%s3116_s2 + $0x98] sm:$0xff] }
  0xe1   :  { %v2266_v48 = vpop.permute.xlu1 %269 }
  0xe6   :  { %803 = vperm.xlu0 %1979, %v2255_v44   ;;  %1921 = vset.pattern.permute.xlu2 %v2077_v3 }
  0xe7   :  { %1920 = vset.pattern.permute.xlu1 %v2083_v5 }
  0xe8   :  { %v2288_v63 = vpop.permute.xlu0 %566  ;;  %v307_v0 = vpop.permute.xlu2 %306 }
  0xe9   :  { %vm976_vm5 = vcmp.ne.f32.partialorder %v307_v0, 0.0 }
  0xea   :  { %v1360_v23 = vsel %vm976_vm5, %v72_v1, 0.0 }
  0xeb   :  { %v1513_v49 = vsel %vm25_vm1, %v1360_v23, 0.0  ;;  %v52_v23 = vld [vmem:[%s3116_s2] sm:$0xff] }
  0xee   :  { %1984 = vset.pattern.permute.xlu0 %v2124_v13  ;;  %397 = vperm.xlu2 %1921, %v2133_v14  }
  0xef   :  { %391 = vperm.xlu1 %1920, %v2133_v14  }
  0xf1   :  { %v283_v56 = vpop.permute.xlu1 %282 }
  0xf2   :  { %vm972_vm4 = vcmp.ne.f32.partialorder %v283_v56, 0.0  ;;  %v75_v56 = vld [vmem:[%s3116_s2 + $0xb8] sm:$0xff] }
  0xf3   :  { %v1356_v58 = vsel %vm972_vm4, %v68_v54, 0.0  ;;  %vm964_vm4 = vcmp.ne.f32.partialorder %v2229_v36, 0.0 }
  0xf4   :  { %v1506_v60 = vsel %vm25_vm1, %v1356_v58, 0.0 }
  0xf5   :  { %v1508_v61 = vadd.f32 %v1507_v57, %v1506_v60  ;;  %v73_v57 = vld [vmem:[%s3116_s2 + $0xa8] sm:$0xff]  ;;  %v1363_v60 = vsel %vm979_vm8, %v75_v56, 0.0  ;;  %vm967_vm8 = vcmp.ne.f32.partialorder %v2257_v45, 0.0 }
  0xf6   :  { %718 = vperm.xlu0 %1984, %v2217_v32   ;;  %1923 = vset.pattern.permute.xlu2 %v2112_v11 }
  0xf7   :  { %1922 = vset.pattern.permute.xlu1 %v2097_v8  ;;  %v1510_v62 = vadd.f32 %v1509_v59, %v1508_v61 }
  0xf8   :  { %v2299_v26 = vpop.permute.xlu0 %597  ;;  %v319_v52 = vpop.permute.xlu2 %318 }
  0xf9   :  { %vm978_vm7 = vcmp.ne.f32.partialorder %v319_v52, 0.0 }
  0xfa   :  { %v1362_v59 = vsel %vm978_vm7, %v74_v55, 0.0  ;;  %v56_v55 = vld [vmem:[%s3116_s2 + $0x20] sm:$0xff]  ;;  %vm966_vm7 = vcmp.ne.f32.partialorder %v2236_v38, 0.0 }
  0xfb   :  { %v1517_v1 = vsel %vm25_vm1, %v1362_v59, 0.0 }
  0xfe   :  { %912 = vperm.xlu0 %1984, %v2202_v27   ;;  %409 = vperm.xlu2 %1923, %v2133_v14  }
  0xff   :  { %403 = vperm.xlu1 %1922, %v2133_v14  }
 0x101   :  { %v301_v22 = vpop.permute.xlu1 %300 }
 0x102   :  { %vm975_vm6 = vcmp.ne.f32.partialorder %v301_v22, 0.0  ;;  %v1519_v22 = vsel %vm25_vm1, %v1363_v60, 0.0 }
 0x103   :  { %v1359_v24 = vsel %vm975_vm6, %v71_v7, 0.0  ;;  %v54_v7 = vld [vmem:[%s3116_s2 + $0x10] sm:$0xff]  ;;  %vm965_vm6 = vcmp.ne.f32.partialorder %v2245_v41, 0.0 }
 0x104   :  { %v1511_v30 = vsel %vm25_vm1, %v1359_v24, 0.0  ;;  %v1342_v33 = vsel %vm958_vm11, %v54_v7, 0.0  ;;  %vm984_vm11 = vcmp.ne.f32.partialorder %v2240_v40, 0.0 }
 0x105   :  { %v1512_v50 = vadd.f32 %v1511_v30, %v1510_v62  ;;  %v53_v62 = vld [vmem:[%s3116_s2 + $0x8] sm:$0xff]  ;;  %v1472_v60 = vsel %vm25_vm1, %v1342_v33, 0.0  ;;  %v60_v33 = vld [vmem:[%s3116_s2 + $0x40] sm:$0xff] }
 0x106   :  { %1989 = vset.pattern.permute.xlu0 %v2136_v15  ;;  %1925 = vset.pattern.permute.xlu2 %v2124_v13  ;;  %v1341_v29 = vsel %vm957_vm10, %v53_v62, 0.0 }
 0x107   :  { %v1514_v51 = vadd.f32 %v1513_v49, %v1512_v50  ;;  %1924 = vset.pattern.permute.xlu1 %v2103_v9  ;;  %v55_v49 = vld [vmem:[%s3116_s2 + $0x18] sm:$0xff]  ;;  %v1470_v52 = vsel %vm25_vm1, %v1341_v29, 0.0 }
 0x108   :  { %v2307_v54 = vpop.permute.xlu0 %627  ;;  %v337_v59 = vpop.permute.xlu2 %336 }
 0x109   :  { %vm981_vm2 = vcmp.ne.f32.partialorder %v337_v59, 0.0  ;;  %v1348_v59 = vsel %vm964_vm4, %v60_v33, 0.0  ;;  %v78_v33 = vld [vmem:[%s3116_s2 + $0xd0] sm:$0xff] }
 0x10e   :  { %536 = vperm.xlu0 %1989, %v2157_v18   ;;  %427 = vperm.xlu2 %1925, %v2133_v14  }
 0x10f   :  { %421 = vperm.xlu1 %1924, %v2133_v14  }
 0x111   :  { %v313_v58 = vpop.permute.xlu1 %312 }
 0x112   :  { %vm977_vm9 = vcmp.ne.f32.partialorder %v313_v58, 0.0 }
 0x113   :  { %v1361_v61 = vsel %vm977_vm9, %v73_v57, 0.0  ;;  %v1343_v57 = vsel %vm959_vm12, %v55_v49, 0.0  ;;  %vm968_vm9 = vcmp.ne.f32.partialorder %v2247_v42, 0.0 }
 0x114   :  { %v1515_v0 = vsel %vm25_vm1, %v1361_v61, 0.0  ;;  %v1344_v61 = vsel %vm960_vm14, %v56_v55, 0.0 }
 0x115   :  { %v1516_v35 = vadd.f32 %v1515_v0, %v1514_v51  ;;  %v1474_v0 = vsel %vm25_vm1, %v1343_v57, 0.0  ;;  %v1476_v37 = vsel %vm25_vm1, %v1344_v61, 0.0  ;;  %v62_v61 = vld [vmem:[%s3116_s2 + $0x50] sm:$0xff] }
 0x116   :  { %924 = vperm.xlu0 %1989, %v2202_v27   ;;  %1927 = vset.pattern.permute.xlu2 %v2136_v15 }
 0x117   :  { %v1518_v24 = vadd.f32 %v1517_v1, %v1516_v35  ;;  %1926 = vset.pattern.permute.xlu1 %v2139_v16  ;;  %v77_v1 = vld [vmem:[%s3116_s2 + $0xc8] sm:$0xff]  ;;  %v1345_v35 = vsel %vm961_vm15, %v57_v25, 0.0 }
 0x118   :  { %v186_v30 = vpop.permute.xlu0 %185  ;;  %v1478_v49 = vsel %vm25_vm1, %v1345_v35, 0.0 }
 0x119   :  { %vm956_vm13 = vcmp.ne.f32.partialorder %v186_v30, 0.0  ;;  %v1520_v51 = vadd.f32 %v1519_v22, %v1518_v24  ;;  %v59_v22 = vld [vmem:[%s3116_s2 + $0x38] sm:$0xff]  ;;  %v1365_v30 = vsel %vm981_vm2, %v77_v1, 0.0  ;;  %v349_v1 = vpop.permute.xlu2 %348 }
 0x11a   :  { %v1340_v50 = vsel %vm956_vm13, %v52_v23, 0.0  ;;  %v1346_v23 = vsel %vm962_vm0, %v58_v28, 0.0  ;;  %v1484_v28 = vsel %vm25_vm1, %v1348_v59, 0.0  ;;  %vm983_vm10 = vcmp.ne.f32.partialorder %v349_v1, 0.0  ;;  %v85_v59 = vld [vmem:[%s3116_s2 + $0x108] sm:$0xff] }
 0x11b   :  { %v1469_v56 = vsel %vm25_vm1, %v1340_v50, 0.0  ;;  %v1347_v50 = vsel %vm963_vm3, %v59_v22, 0.0  ;;  %v1480_v55 = vsel %vm25_vm1, %v1346_v23, 0.0  ;;  %vm989_vm13 = vcmp.ne.f32.partialorder %v2249_v43, 0.0 }
 0x11c   :  { %v1471_v58 = vadd.f32 %v1470_v52, %v1469_v56  ;;  %v61_v56 = vld [vmem:[%s3116_s2 + $0x48] sm:$0xff]  ;;  %v1482_v36 = vsel %vm25_vm1, %v1347_v50, 0.0 }
 0x11e   :  { %v1473_v62 = vadd.f32 %v1472_v60, %v1471_v58  ;;  %1994 = vset.pattern.permute.xlu0 %v2222_v34  ;;  %439 = vperm.xlu2 %1927, %v2133_v14   ;;  %v1523_v58 = vsel %vm25_vm1, %v1365_v30, 0.0 }
 0x11f   :  { %433 = vperm.xlu1 %1926, %v2133_v14  }
 0x120   :  { %v1475_v7 = vadd.f32 %v1474_v0, %v1473_v62  ;;  %v1349_v62 = vsel %vm965_vm6, %v61_v56, 0.0 }
 0x121   :  { %v331_v24 = vpop.permute.xlu1 %330  ;;  %v1486_v38 = vsel %vm25_vm1, %v1349_v62, 0.0 }
 0x122   :  { %v1477_v29 = vadd.f32 %v1476_v37, %v1475_v7  ;;  %vm980_vm5 = vcmp.ne.f32.partialorder %v331_v24, 0.0  ;;  %v64_v7 = vld [vmem:[%s3116_s2 + $0x60] sm:$0xff]  ;;  %v79_v24 = vld [vmem:[%s3116_s2 + $0xd8] sm:$0xff] }
 0x123   :  { %v1364_v39 = vsel %vm980_vm5, %v76_v31, 0.0  ;;  %v1352_v23 = vsel %vm968_vm9, %v64_v7, 0.0  ;;  %v81_v7 = vld [vmem:[%s3116_s2 + $0xe8] sm:$0xff] }
 0x124   :  { %v1479_v52 = vadd.f32 %v1478_v49, %v1477_v29  ;;  %v1521_v57 = vsel %vm25_vm1, %v1364_v39, 0.0  ;;  %v1492_v30 = vsel %vm25_vm1, %v1352_v23, 0.0  ;;  %v80_v49 = vld [vmem:[%s3116_s2 + $0xe0] sm:$0xff] }
 0x125   :  { %v1522_v25 = vadd.f32 %v1521_v57, %v1520_v51  ;;  %v1350_v51 = vsel %vm966_vm7, %v62_v61, 0.0  ;;  %v1368_v56 = vsel %vm984_vm11, %v80_v49, 0.0  ;;  %v1373_v61 = vsel %vm989_vm13, %v85_v59, 0.0  ;;  %v86_v59 = vld [vmem:[%s3116_s2 + $0x110] sm:$0xff] }
 0x126   :  { %v1481_v60 = vadd.f32 %v1480_v55, %v1479_v52  ;;  %263 = vperm.xlu0 %1994, %v2089_v6   ;;  %1930 = vset.pattern.permute.xlu2 %v2222_v34  ;;  %v63_v6 = vld [vmem:[%s3116_s2 + $0x58] sm:$0xff]  ;;  %v1488_v31 = vsel %vm25_vm1, %v1350_v51, 0.0  ;;  %v1367_v52 = vsel %vm983_vm10, %v79_v24, 0.0  ;;  %vm999_vm11 = vcmp.ne.f32.partialorder %v2262_v47, 0.0 }
 0x127   :  { %v1524_v0 = vadd.f32 %v1523_v58, %v1522_v25  ;;  %1929 = vset.pattern.permute.xlu1 %v2118_v12  ;;  %v1351_v37 = vsel %vm967_vm8, %v63_v6, 0.0  ;;  %v2420_v58 = vpop.permute.xlu0 %476  ;;  %v1544_v6 = vsel %vm25_vm1, %v1373_v61, 0.0  ;;  %vm970_vm13 = vcmp.ne.f32.partialorder %v2266_v48, 0.0 }
 0x128   :  { %v1483_v41 = vadd.f32 %v1482_v36, %v1481_v60  ;;  %v1490_v45 = vsel %vm25_vm1, %v1351_v37, 0.0  ;;  %v367_v39 = vpop.permute.xlu2 %366  ;;  %v1527_v60 = vsel %vm25_vm1, %v1367_v52, 0.0  ;;  %v1529_v36 = vsel %vm25_vm1, %v1368_v56, 0.0 }
 0x129   :  { %vm986_vm15 = vcmp.ne.f32.partialorder %v367_v39, 0.0 }
 0x12a   :  { %v1485_v35 = vadd.f32 %v1484_v28, %v1483_v41  ;;  %v84_v41 = vld [vmem:[%s3116_s2 + $0x100] sm:$0xff] }
 0x12c   :  { %v1487_v22 = vadd.f32 %v1486_v38, %v1485_v35  ;;  %v82_v38 = vld [vmem:[%s3116_s2 + $0xf0] sm:$0xff] }
 0x12e   :  { %v1489_v29 = vadd.f32 %v1488_v31, %v1487_v22  ;;  %748 = vperm.xlu0 %1994, %v2217_v32   ;;  %457 = vperm.xlu2 %1930, %v2133_v14   ;;  %v1370_v22 = vsel %vm986_vm15, %v82_v38, 0.0 }
 0x12f   :  { %451 = vperm.xlu1 %1929, %v2133_v14   ;;  %v2437_v1 = vpop.permute.xlu0 %864 }
 0x130   :  { %v1491_v42 = vadd.f32 %v1490_v45, %v1489_v29  ;;  %v1533_v29 = vsel %vm25_vm1, %v1370_v22, 0.0 }
 0x131   :  { %v343_v50 = vpop.permute.xlu1 %342 }
 0x132   :  { %v2418_v55 = vadd.f32 %v1492_v30, %v1491_v42  ;;  %vm982_vm12 = vcmp.ne.f32.partialorder %v343_v50, 0.0  ;;  %v83_v42 = vld [vmem:[%s3116_s2 + $0xf8] sm:$0xff] }
 0x133   :  { %v1366_v57 = vsel %vm982_vm12, %v78_v33, 0.0 }
 0x134   :  { %v1525_v40 = vsel %vm25_vm1, %v1366_v57, 0.0  ;;  %v87_v57 = vld [vmem:[%s3116_s2 + $0x118] sm:$0xff] }
 0x135   :  { %v1526_v25 = vadd.f32 %v1525_v40, %v1524_v0 }
 0x136   :  { %1997 = vset.pattern.permute.xlu0 %v2163_v20  ;;  %1932 = vset.pattern.permute.xlu2 %v2160_v19 }
 0x137   :  { %v1528_v62 = vadd.f32 %v1527_v60, %v1526_v25  ;;  %1931 = vset.pattern.permute.xlu1 %v2163_v20 }
 0x138   :  { %v380_v28 = vpop.permute.xlu2 %379 }
 0x139   :  { %v1530_v43 = vadd.f32 %v1529_v36, %v1528_v62  ;;  %vm988_vm14 = vcmp.ne.f32.partialorder %v380_v28, 0.0 }
 0x13a   :  { %v1372_v0 = vsel %vm988_vm14, %v84_v41, 0.0  ;;  %vm971_vm14 = vcmp.ne.f32.partialorder %v2259_v46, 0.0  ;;  %v97_v46 = vld [vmem:[%s3116_s2 + $0x168] sm:$0xff] }
 0x13b   :  { %v1543_v51 = vsel %vm25_vm1, %v1372_v0, 0.0 }
 0x13c   :  { %v1545_v35 = vadd.f32 %v1544_v6, %v1543_v51  ;;  %v89_v6 = vld [vmem:[%s3116_s2 + $0x128] sm:$0xff]  ;;  %v88_v51 = vld [vmem:[%s3116_s2 + $0x120] sm:$0xff] }
 0x13e   :  { %657 = vperm.xlu0 %1997, %v2178_v21   ;;  %469 = vperm.xlu2 %1932, %v2133_v14  }
 0x13f   :  { %463 = vperm.xlu1 %1931, %v2133_v14   ;;  %v2453_v14 = vpop.permute.xlu0 %688 }
 0x141   :  { %v361_v37 = vpop.permute.xlu1 %360 }
 0x142   :  { %vm985_vm0 = vcmp.ne.f32.partialorder %v361_v37, 0.0 }
 0x143   :  { %v1369_v31 = vsel %vm985_vm0, %v81_v7, 0.0 }
 0x144   :  { %v1531_v23 = vsel %vm25_vm1, %v1369_v31, 0.0 }
 0x145   :  { %v1532_v45 = vadd.f32 %v1531_v23, %v1530_v43 }
 0x146   :  { %851 = vperm.xlu0 %1997, %v2255_v44   ;;  %1934 = vset.pattern.permute.xlu2 %v2083_v5 }
 0x147   :  { %v1534_v24 = vadd.f32 %v1533_v29, %v1532_v45  ;;  %1933 = vset.pattern.permute.xlu1 %v2080_v4  ;;  %v2460_v49 = vpop.permute.xlu0 %882  ;;  %v90_v45 = vld [vmem:[%s3116_s2 + $0x130] sm:$0xff] }
 0x148   :  { %v398_v39 = vpop.permute.xlu2 %397 }
 0x149   :  { %vm991_vm3 = vcmp.ne.f32.partialorder %v398_v39, 0.0 }
 0x14a   :  { %v1375_v60 = vsel %vm991_vm3, %v87_v57, 0.0  ;;  %vm1773_vm3 = vcmask 1041409  }
 0x14b   :  { %v1548_v61 = vsel %vm25_vm1, %v1375_v60, 0.0 }
 0x14e   :  { %488 = vperm.xlu2 %1934, %v2157_v18  }
 0x14f   :  { %482 = vperm.xlu1 %1933, %v2157_v18  }
 0x150   :  { %v416_v56 = vpop.permute.xlu0 %415 }
 0x151   :  { %v373_v30 = vpop.permute.xlu1 %372  ;;  %vm994_vm7 = vcmp.ne.f32.partialorder %v416_v56, 0.0 }
 0x152   :  { %vm987_vm2 = vcmp.ne.f32.partialorder %v373_v30, 0.0  ;;  %v92_v30 = vld [vmem:[%s3116_s2 + $0x140] sm:$0xff] }
 0x153   :  { %v1371_v33 = vsel %vm987_vm2, %v83_v42, 0.0  ;;  %v1378_v42 = vsel %vm994_vm7, %v90_v45, 0.0  ;;  %v66_v45 = vld [vmem:[%s3116_s2 + $0x70] sm:$0xff] }
 0x154   :  { %v1535_v50 = vsel %vm25_vm1, %v1371_v33, 0.0  ;;  %v1554_v33 = vsel %vm25_vm1, %v1378_v42, 0.0  ;;  %v1354_v48 = vsel %vm970_vm13, %v66_v45, 0.0 }
 0x155   :  { %v2463_v52 = vadd.f32 %v1535_v50, %v1534_v24  ;;  %v91_v50 = vld [vmem:[%s3116_s2 + $0x138] sm:$0xff] }
 0x156   :  { %1936 = vset.pattern.permute.xlu2 %v2097_v8 }
 0x157   :  { %1935 = vset.pattern.permute.xlu1 %v2077_v3  ;;  %v1537_v42 = vrot.slane %v2463_v52, 4 }
 0x158   :  { %v2477_v41 = vpop.permute.xlu0 %803  ;;  %v410_v28 = vpop.permute.xlu2 %409 }
 0x159   :  { %vm993_vm5 = vcmp.ne.f32.partialorder %v410_v28, 0.0  ;;  %v94_v28 = vld [vmem:[%s3116_s2 + $0x150] sm:$0xff] }
 0x15a   :  { %v1377_v38 = vsel %vm993_vm5, %v89_v6, 0.0  ;;  %v95_v6 = vld [vmem:[%s3116_s2 + $0x158] sm:$0xff] }
 0x15b   :  { %v1552_v22 = vsel %vm25_vm1, %v1377_v38, 0.0 }
 0x15e   :  { %500 = vperm.xlu2 %1936, %v2157_v18  }
 0x15f   :  { %494 = vperm.xlu1 %1935, %v2157_v18  }
 0x161   :  { %v392_v40 = vpop.permute.xlu1 %391 }
 0x162   :  { %vm990_vm4 = vcmp.ne.f32.partialorder %v392_v40, 0.0 }
 0x163   :  { %v1374_v25 = vsel %vm990_vm4, %v86_v59, 0.0 }
 0x164   :  { %v1546_v36 = vsel %vm25_vm1, %v1374_v25, 0.0 }
 0x165   :  { %v1547_v62 = vadd.f32 %v1546_v36, %v1545_v35 }
 0x166   :  { %1939 = vset.pattern.permute.xlu2 %v2103_v9 }
 0x167   :  { %v1549_v43 = vadd.f32 %v1548_v61, %v1547_v62  ;;  %1938 = vset.pattern.permute.xlu1 %v2109_v10 }
 0x168   :  { %v2486_v0 = vpop.permute.xlu0 %718  ;;  %v428_v24 = vpop.permute.xlu2 %427 }
 0x169   :  { %vm996_vm8 = vcmp.ne.f32.partialorder %v428_v24, 0.0  ;;  %v65_v24 = vld [vmem:[%s3116_s2 + $0x68] sm:$0xff] }
 0x16a   :  { %v1380_v57 = vsel %vm996_vm8, %v92_v30, 0.0 }
 0x16b   :  { %v1558_v25 = vsel %vm25_vm1, %v1380_v57, 0.0 }
 0x16e   :  { %518 = vperm.xlu2 %1939, %v2157_v18  }
 0x16f   :  { %512 = vperm.xlu1 %1938, %v2157_v18  }
 0x170   :  { %v2495_v29 = vpop.permute.xlu0 %912 }
 0x171   :  { %v404_v35 = vpop.permute.xlu1 %403 }
 0x172   :  { %vm992_vm6 = vcmp.ne.f32.partialorder %v404_v35, 0.0 }
 0x173   :  { %v1376_v7 = vsel %vm992_vm6, %v88_v51, 0.0  ;;  %v93_v51 = vld [vmem:[%s3116_s2 + $0x148] sm:$0xff]  ;;  %vm1004_vm6 = vcmp.ne.f32.partialorder %v2420_v58, 0.0 }
 0x174   :  { %v1550_v37 = vsel %vm25_vm1, %v1376_v7, 0.0  ;;  %v1383_v7 = vsel %vm999_vm11, %v95_v6, 0.0  ;;  %vm1009_vm11 = vcmp.ne.f32.partialorder %v2277_v53, 0.0 }
 0x175   :  { %v1551_v31 = vadd.f32 %v1550_v37, %v1549_v43  ;;  %v1564_v47 = vsel %vm25_vm1, %v1383_v7, 0.0 }
 0x176   :  { %1941 = vset.pattern.permute.xlu2 %v2139_v16 }
 0x177   :  { %v1553_v23 = vadd.f32 %v1552_v22, %v1551_v31  ;;  %1940 = vset.pattern.permute.xlu1 %v2124_v13 }
 0x178   :  { %v440_v62 = vpop.permute.xlu2 %439 }
 0x179   :  { %v1555_v59 = vadd.f32 %v1554_v33, %v1553_v23  ;;  %vm998_vm10 = vcmp.ne.f32.partialorder %v440_v62, 0.0 }
 0x17a   :  { %v1382_v38 = vsel %vm998_vm10, %v94_v28, 0.0 }
 0x17b   :  { %v1562_v31 = vsel %vm25_vm1, %v1382_v38, 0.0 }
 0x17e   :  { %530 = vperm.xlu2 %1941, %v2157_v18  }
 0x17f   :  { %524 = vperm.xlu1 %1940, %v2157_v18  }
 0x180   :  { %v2509_v40 = vpop.permute.xlu0 %536 }
 0x181   :  { %v422_v39 = vpop.permute.xlu1 %421 }
 0x182   :  { %vm995_vm9 = vcmp.ne.f32.partialorder %v422_v39, 0.0 }
 0x183   :  { %v1379_v56 = vsel %vm995_vm9, %v91_v50, 0.0  ;;  %v67_v50 = vld [vmem:[%s3116_s2 + $0x78] sm:$0xff]  ;;  %vm1775_vm9 = vcmask 1042434  }
 0x184   :  { %v1556_v60 = vsel %vm25_vm1, %v1379_v56, 0.0 }
 0x185   :  { %v1557_v36 = vadd.f32 %v1556_v60, %v1555_v59  ;;  %v1355_v59 = vsel %vm971_vm14, %v67_v50, 0.0  ;;  %v1538_v60 = vadd.f32 %v1537_v42, %v2463_v52 }
 0x186   :  { %1943 = vset.pattern.permute.xlu2 %v2118_v12  ;;  %v1498_v28 = vsel %vm25_vm1, %v1355_v59, 0.0 }
 0x187   :  { %v1559_v61 = vadd.f32 %v1558_v25, %v1557_v36  ;;  %1942 = vset.pattern.permute.xlu1 %v2145_v17  ;;  %v1539_v6 = vrot.slane %v1538_v60, 2 }
 0x188   :  { %v2515_v43 = vpop.permute.xlu0 %924  ;;  %v458_v36 = vpop.permute.xlu2 %457 }
 0x189   :  { %vm1001_vm0 = vcmp.ne.f32.partialorder %v458_v36, 0.0  ;;  %v1540_v7 = vadd.f32 %v1539_v6, %v1538_v60 }
 0x18a   :  { %v1385_v38 = vsel %vm1001_vm0, %v97_v46, 0.0 }
 0x18e   :  { %548 = vperm.xlu2 %1943, %v2157_v18  }
 0x18f   :  { %542 = vperm.xlu1 %1942, %v2157_v18  }
 0x191   :  { %v434_v35 = vpop.permute.xlu1 %433 }
 0x192   :  { %vm997_vm12 = vcmp.ne.f32.partialorder %v434_v35, 0.0 }
 0x193   :  { %v1381_v37 = vsel %vm997_vm12, %v93_v51, 0.0 }
 0x194   :  { %v1560_v22 = vsel %vm25_vm1, %v1381_v37, 0.0 }
 0x195   :  { %v1561_v23 = vadd.f32 %v1560_v22, %v1559_v61  ;;  %v1496_v61 = vsel %vm25_vm1, %v1354_v48, 0.0 }
 0x196   :  { %1945 = vset.pattern.permute.xlu2 %v2163_v20 }
 0x197   :  { %v1563_v30 = vadd.f32 %v1562_v31, %v1561_v23  ;;  %1944 = vset.pattern.permute.xlu1 %v2222_v34  ;;  %v1568_v23 = vsel %vm25_vm1, %v1385_v38, 0.0 }
 0x198   :  { %v264_v33 = vpop.permute.xlu0 %263  ;;  %v470_v48 = vpop.permute.xlu2 %469 }
 0x199   :  { %vm969_vm15 = vcmp.ne.f32.partialorder %v264_v33, 0.0  ;;  %v1565_v57 = vadd.f32 %v1564_v47, %v1563_v30  ;;  %vm1003_vm4 = vcmp.ne.f32.partialorder %v470_v48, 0.0  ;;  %v104_v48 = vld [vmem:[%s3116_s2 + $0x1a0] sm:$0xff] }
 0x19a   :  { %v1353_v39 = vsel %vm969_vm15, %v65_v24, 0.0  ;;  %v1541_v24 = vrot.slane %v1540_v7, 1 }
 0x19b   :  { %v1494_v56 = vsel %vm25_vm1, %v1353_v39, 0.0 }
 0x19c   :  { %v1495_v25 = vadd.f32 %v1494_v56, %v2418_v55  ;;  %v96_v55 = vld [vmem:[%s3116_s2 + $0x160] sm:$0xff]  ;;  %v1542_v33 = vadd.f32 %v1541_v24, %v1540_v7  ;;  %v99_v56 = vld [vmem:[%s3116_s2 + $0x178] sm:$0xff] }
 0x19d   :  { %v1387_v60 = vsel %vm1003_vm4, %v99_v56, 0.0  ;;  %v103_v56 = vld [vmem:[%s3116_s2 + $0x198] sm:$0xff] }
 0x19e   :  { %v1497_v62 = vadd.f32 %v1496_v61, %v1495_v25  ;;  %560 = vperm.xlu2 %1945, %v2157_v18   ;;  %v1572_v61 = vsel %vm25_vm1, %v1387_v60, 0.0 }
 0x19f   :  { %554 = vperm.xlu1 %1944, %v2157_v18  }
 0x1a0   :  { %v1499_v51 = vadd.f32 %v1498_v28, %v1497_v62 }
 0x1a1   :  { %v452_v35 = vpop.permute.xlu1 %451 }
 0x1a2   :  { %v1500_v52 = vrot.slane %v1499_v51, 4  ;;  %vm1000_vm2 = vcmp.ne.f32.partialorder %v452_v35, 0.0  ;;  %v102_v35 = vld [vmem:[%s3116_s2 + $0x190] sm:$0xff] }
 0x1a3   :  { %v1384_v22 = vsel %vm1000_vm2, %v96_v55, 0.0  ;;  %v100_v55 = vld [vmem:[%s3116_s2 + $0x180] sm:$0xff]  ;;  %vm1014_vm2 = vcmp.ne.f32.partialorder %v2509_v40, 0.0 }
 0x1a4   :  { %v1501_v37 = vadd.f32 %v1500_v52, %v1499_v51  ;;  %v1566_v31 = vsel %vm25_vm1, %v1384_v22, 0.0  ;;  %v1388_v38 = vsel %vm1004_vm6, %v100_v55, 0.0  ;;  %v106_v55 = vld [vmem:[%s3116_s2 + $0x1b0] sm:$0xff]  ;;  %vm1019_vm6 = vcmp.ne.f32.partialorder %v2288_v63, 0.0 }
 0x1a5   :  { %v1567_v47 = vadd.f32 %v1566_v31, %v1565_v57  ;;  %v98_v57 = vld [vmem:[%s3116_s2 + $0x170] sm:$0xff]  ;;  %v1580_v58 = vsel %vm25_vm1, %v1388_v38, 0.0 }
 0x1a6   :  { %v1502_v45 = vrot.slane %v1501_v37, 2  ;;  %1948 = vset.pattern.permute.xlu2 %v2080_v4 }
 0x1a7   :  { %v1569_v18 = vadd.f32 %v1568_v23, %v1567_v47  ;;  %1947 = vset.pattern.permute.xlu1 %v2074_v2 }
 0x1a8   :  { %v1503_v42 = vadd.f32 %v1502_v45, %v1501_v37  ;;  %v489_v51 = vpop.permute.xlu2 %488  ;;  %v101_v37 = vld [vmem:[%s3116_s2 + $0x188] sm:$0xff] }
 0x1a9   :  { %vm1006_vm7 = vcmp.ne.f32.partialorder %v489_v51, 0.0  ;;  %v107_v51 = vld [vmem:[%s3116_s2 + $0x1b8] sm:$0xff] }
 0x1aa   :  { %v1504_v30 = vrot.slane %v1503_v42, 1  ;;  %v1390_v23 = vsel %vm1006_vm7, %v102_v35, 0.0 }
 0x1ac   :  { %v1505_v50 = vadd.f32 %v1504_v30, %v1503_v42  ;;  %v1583_v42 = vsel %vm25_vm1, %v1390_v23, 0.0 }
 0x1ae   :  { %v1774_v39 = vsel %vm1773_vm3, %v1542_v33, %v1505_v50  ;;  %579 = vperm.xlu2 %1948, %v2178_v21  }
 0x1af   :  { %573 = vperm.xlu1 %1947, %v2178_v21  }
 0x1b1   :  { %v464_v59 = vpop.permute.xlu1 %463 }
 0x1b2   :  { %vm1002_vm5 = vcmp.ne.f32.partialorder %v464_v59, 0.0 }
 0x1b3   :  { %v1386_v25 = vsel %vm1002_vm5, %v98_v57, 0.0 }
 0x1b4   :  { %v1570_v36 = vsel %vm25_vm1, %v1386_v25, 0.0 }
 0x1b5   :  { %v1571_v62 = vadd.f32 %v1570_v36, %v1569_v18 }
 0x1b6   :  { %1950 = vset.pattern.permute.xlu2 %v2077_v3 }
 0x1b7   :  { %v1573_v28 = vadd.f32 %v1572_v61, %v1571_v62  ;;  %1949 = vset.pattern.permute.xlu1 %v2083_v5 }
 0x1b8   :  { %v501_v50 = vpop.permute.xlu2 %500 }
 0x1b9   :  { %v1574_v46 = vrot.slane %v1573_v28, 4  ;;  %vm1008_vm10 = vcmp.ne.f32.partialorder %v501_v50, 0.0 }
 0x1ba   :  { %v1392_v59 = vsel %vm1008_vm10, %v104_v48, 0.0  ;;  %vm1777_vm10 = vcmask 1043459  }
 0x1bb   :  { %v1575_v6 = vadd.f32 %v1574_v46, %v1573_v28  ;;  %v1587_v61 = vsel %vm25_vm1, %v1392_v59, 0.0  ;;  %v112_v59 = vld [vmem:[%s3116_s2 + $0x1e0] sm:$0xff] }
 0x1bd   :  { %v1576_v52 = vrot.slane %v1575_v6, 2 }
 0x1be   :  { %591 = vperm.xlu2 %1950, %v2178_v21  }
 0x1bf   :  { %v1577_v7 = vadd.f32 %v1576_v52, %v1575_v6  ;;  %585 = vperm.xlu1 %1949, %v2178_v21  }
 0x1c1   :  { %v1578_v22 = vrot.slane %v1577_v7, 1  ;;  %v483_v31 = vpop.permute.xlu1 %482 }
 0x1c2   :  { %vm1005_vm8 = vcmp.ne.f32.partialorder %v483_v31, 0.0 }
 0x1c3   :  { %v1579_v45 = vadd.f32 %v1578_v22, %v1577_v7  ;;  %v1389_v47 = vsel %vm1005_vm8, %v101_v37, 0.0 }
 0x1c4   :  { %v1581_v24 = vsel %vm25_vm1, %v1389_v47, 0.0 }
 0x1c5   :  { %v1582_v18 = vadd.f32 %v1581_v24, %v1580_v58  ;;  %v2590_v30 = vsel %vm1775_vm9, %v1579_v45, %v1774_v39  ;;  %v105_v39 = vld [vmem:[%s3116_s2 + $0x1a8] sm:$0xff]  ;;  %v108_v45 = vld [vmem:[%s3116_s2 + $0x1c0] sm:$0xff] }
 0x1c6   :  { %1953 = vset.pattern.permute.xlu2 %v2109_v10  ;;  %v1393_v60 = vsel %vm1009_vm11, %v105_v39, 0.0  ;;  %v109_v58 = vld [vmem:[%s3116_s2 + $0x1c8] sm:$0xff]  ;;  %v110_v39 = vld [vmem:[%s3116_s2 + $0x1d0] sm:$0xff] }
 0x1c7   :  { %v1584_v33 = vadd.f32 %v1583_v42, %v1582_v18  ;;  %1952 = vset.pattern.permute.xlu1 %v2112_v11  ;;  %v1589_v28 = vsel %vm25_vm1, %v1393_v60, 0.0 }
 0x1c8   :  { %v519_v6 = vpop.permute.xlu2 %518 }
 0x1c9   :  { %vm1011_vm13 = vcmp.ne.f32.partialorder %v519_v6, 0.0 }
 0x1ca   :  { %v1395_v35 = vsel %vm1011_vm13, %v107_v51, 0.0 }
 0x1cb   :  { %v1593_v37 = vsel %vm25_vm1, %v1395_v35, 0.0  ;;  %v113_v35 = vld [vmem:[%s3116_s2 + $0x1e8] sm:$0xff] }
 0x1ce   :  { %609 = vperm.xlu2 %1953, %v2178_v21  }
 0x1cf   :  { %603 = vperm.xlu1 %1952, %v2178_v21  }
 0x1d1   :  { %v495_v57 = vpop.permute.xlu1 %494 }
 0x1d2   :  { %vm1007_vm12 = vcmp.ne.f32.partialorder %v495_v57, 0.0  ;;  %v1398_v57 = vsel %vm1014_vm2, %v110_v39, 0.0 }
 0x1d3   :  { %v1391_v25 = vsel %vm1007_vm12, %v103_v56, 0.0  ;;  %v1599_v60 = vsel %vm25_vm1, %v1398_v57, 0.0  ;;  %vm1024_vm12 = vcmp.ne.f32.partialorder %v2299_v26, 0.0 }
 0x1d4   :  { %v1585_v36 = vsel %vm25_vm1, %v1391_v25, 0.0  ;;  %v111_v25 = vld [vmem:[%s3116_s2 + $0x1d8] sm:$0xff] }
 0x1d5   :  { %v1586_v62 = vadd.f32 %v1585_v36, %v1584_v33 }
 0x1d6   :  { %1955 = vset.pattern.permute.xlu2 %v2124_v13 }
 0x1d7   :  { %v1588_v46 = vadd.f32 %v1587_v61, %v1586_v62  ;;  %1954 = vset.pattern.permute.xlu1 %v2103_v9 }
 0x1d8   :  { %v531_v23 = vpop.permute.xlu2 %530 }
 0x1d9   :  { %v1590_v53 = vadd.f32 %v1589_v28, %v1588_v46  ;;  %vm1013_vm15 = vcmp.ne.f32.partialorder %v531_v23, 0.0 }
 0x1da   :  { %v1397_v24 = vsel %vm1013_vm15, %v109_v58, 0.0 }
 0x1db   :  { %v1597_v33 = vsel %vm25_vm1, %v1397_v24, 0.0 }
 0x1de   :  { %621 = vperm.xlu2 %1955, %v2178_v21  }
 0x1df   :  { %615 = vperm.xlu1 %1954, %v2178_v21  }
 0x1e1   :  { %v513_v52 = vpop.permute.xlu1 %512 }
 0x1e2   :  { %vm1010_vm14 = vcmp.ne.f32.partialorder %v513_v52, 0.0  ;;  %v115_v52 = vld [vmem:[%s3116_s2 + $0x1f8] sm:$0xff] }
 0x1e3   :  { %v1394_v38 = vsel %vm1010_vm14, %v106_v55, 0.0  ;;  %v114_v55 = vld [vmem:[%s3116_s2 + $0x1f0] sm:$0xff] }
 0x1e4   :  { %v1591_v7 = vsel %vm25_vm1, %v1394_v38, 0.0 }
 0x1e5   :  { %v1592_v22 = vadd.f32 %v1591_v7, %v1590_v53 }
 0x1e6   :  { %1959 = vset.pattern.permute.xlu2 %v2145_v17 }
 0x1e7   :  { %v1594_v31 = vadd.f32 %v1593_v37, %v1592_v22  ;;  %1958 = vset.pattern.permute.xlu1 %v2136_v15  ;;  %v1403_v37 = vsel %vm1019_vm6, %v115_v52, 0.0  ;;  %vm1029_vm6 = vcmp.ne.f32.partialorder %v2307_v54, 0.0 }
 0x1e8   :  { %v549_v56 = vpop.permute.xlu2 %548  ;;  %v1609_v58 = vsel %vm25_vm1, %v1403_v37, 0.0 }
 0x1e9   :  { %vm1016_vm3 = vcmp.ne.f32.partialorder %v549_v56, 0.0 }
 0x1ea   :  { %v1400_v61 = vsel %vm1016_vm3, %v112_v59, 0.0 }
 0x1eb   :  { %v1603_v46 = vsel %vm25_vm1, %v1400_v61, 0.0 }
 0x1ee   :  { %639 = vperm.xlu2 %1959, %v2178_v21  }
 0x1ef   :  { %633 = vperm.xlu1 %1958, %v2178_v21  }
 0x1f1   :  { %v525_v47 = vpop.permute.xlu1 %524 }
 0x1f2   :  { %vm1012_vm0 = vcmp.ne.f32.partialorder %v525_v47, 0.0 }
 0x1f3   :  { %v1396_v42 = vsel %vm1012_vm0, %v108_v45, 0.0 }
 0x1f4   :  { %v1595_v18 = vsel %vm25_vm1, %v1396_v42, 0.0  ;;  %v117_v42 = vld [vmem:[%s3116_s2 + $0x208] sm:$0xff] }
 0x1f5   :  { %v1596_v50 = vadd.f32 %v1595_v18, %v1594_v31 }
 0x1f6   :  { %1961 = vset.pattern.permute.xlu2 %v2222_v34 }
 0x1f7   :  { %v1598_v48 = vadd.f32 %v1597_v33, %v1596_v50  ;;  %1960 = vset.pattern.permute.xlu1 %v2118_v12 }
 0x1f8   :  { %v561_v51 = vpop.permute.xlu2 %560 }
 0x1f9   :  { %v1600_v62 = vadd.f32 %v1599_v60, %v1598_v48  ;;  %vm1018_vm5 = vcmp.ne.f32.partialorder %v561_v51, 0.0  ;;  %v116_v48 = vld [vmem:[%s3116_s2 + $0x200] sm:$0xff] }
 0x1fa   :  { %v1402_v7 = vsel %vm1018_vm5, %v114_v55, 0.0 }
 0x1fb   :  { %v1607_v23 = vsel %vm25_vm1, %v1402_v7, 0.0 }
 0x1fe   :  { %651 = vperm.xlu2 %1961, %v2178_v21  }
 0x1ff   :  { %645 = vperm.xlu1 %1960, %v2178_v21  }
 0x201   :  { %v543_v36 = vpop.permute.xlu1 %542 }
 0x202   :  { %vm1015_vm4 = vcmp.ne.f32.partialorder %v543_v36, 0.0 }
 0x203   :  { %v1399_v40 = vsel %vm1015_vm4, %v111_v25, 0.0 }
 0x204   :  { %v1601_v28 = vsel %vm25_vm1, %v1399_v40, 0.0 }
 0x205   :  { %v1602_v53 = vadd.f32 %v1601_v28, %v1600_v62  ;;  %v119_v28 = vld [vmem:[%s3116_s2 + $0x218] sm:$0xff] }
 0x206   :  { %1963 = vset.pattern.permute.xlu2 %v2074_v2 }
 0x207   :  { %v1604_v6 = vadd.f32 %v1603_v46, %v1602_v53  ;;  %1962 = vset.pattern.permute.xlu1 %v2160_v19  ;;  %v120_v46 = vld [vmem:[%s3116_s2 + $0x220] sm:$0xff] }
 0x208   :  { %v580_v47 = vpop.permute.xlu2 %579  ;;  %v1408_v51 = vsel %vm1024_vm12, %v120_v46, 0.0  ;;  %v124_v46 = vld [vmem:[%s3116_s2 + $0x240] sm:$0xff] }
 0x209   :  { %vm1021_vm8 = vcmp.ne.f32.partialorder %v580_v47, 0.0  ;;  %v1624_v7 = vsel %vm25_vm1, %v1408_v51, 0.0 }
 0x20a   :  { %v1405_v50 = vsel %vm1021_vm8, %v117_v42, 0.0 }
 0x20b   :  { %v1618_v57 = vsel %vm25_vm1, %v1405_v50, 0.0 }
 0x20e   :  { %670 = vperm.xlu2 %1963, %v2217_v32  }
 0x20f   :  { %663 = vperm.xlu1 %1962, %v2178_v21  }
 0x211   :  { %v555_v38 = vpop.permute.xlu1 %554 }
 0x212   :  { %vm1017_vm7 = vcmp.ne.f32.partialorder %v555_v38, 0.0 }
 0x213   :  { %v1401_v22 = vsel %vm1017_vm7, %v113_v35, 0.0 }
 0x214   :  { %v1605_v31 = vsel %vm25_vm1, %v1401_v22, 0.0  ;;  %v1814_v22 = vld [vmem:[#allocation3] sm:$0xff] }
 0x215   :  { %v1606_v21 = vadd.f32 %v1605_v31, %v1604_v6  ;;  %v1816_v31 = vmax.f32 %v1814_v22, 1.0 }
 0x216   :  { %1965 = vset.pattern.permute.xlu2 %v2083_v5 }
 0x217   :  { %v1608_v45 = vadd.f32 %v1607_v23, %v1606_v21  ;;  %1964 = vset.pattern.permute.xlu1 %v2080_v4  ;;  %2006 = vrcp.f32 %v1816_v31  ;;  %v122_v21 = vld [vmem:[%s3116_s2 + $0x230] sm:$0xff]  ;;  %vm1822_vm0 = vweird.f32 %v1816_v31 }
 0x218   :  { %v592_v62 = vpop.permute.xlu2 %591 }
 0x219   :  { %v1610_v63 = vadd.f32 %v1609_v58, %v1608_v45  ;;  %vm1023_vm11 = vcmp.ne.f32.partialorder %v592_v62, 0.0  ;;  %v121_v58 = vld [vmem:[%s3116_s2 + $0x228] sm:$0xff] }
 0x21a   :  { %v1407_v6 = vsel %vm1023_vm11, %v119_v28, 0.0 }
 0x21b   :  { %v1611_v24 = vrot.slane %v1610_v63, 4  ;;  %v1622_v35 = vsel %vm25_vm1, %v1407_v6, 0.0 }
 0x21d   :  { %v1612_v18 = vadd.f32 %v1611_v24, %v1610_v63  ;;  %v2007_v47 = vpop.eup %2006 }
 0x21e   :  { %682 = vperm.xlu2 %1965, %v2217_v32   ;;  %v1818_v42 = vmul.f32 %v2007_v47, %v1816_v31  ;;  %vm1823_vm2 = vweird.f32 %v2007_v47 }
 0x21f   :  { %v1613_v33 = vrot.slane %v1612_v18, 2  ;;  %676 = vperm.xlu1 %1964, %v2217_v32   ;;  %vm1824_vm3 = vmor %vm1822_vm0, %vm1823_vm2  ;;  %vm1039_vm0 = vcmp.ne.f32.partialorder %v2453_v14, 0.0  ;;  %vm1779_vm2 = vcmask 1044484  }
 0x221   :  { %v1614_v39 = vadd.f32 %v1613_v33, %v1612_v18  ;;  %v574_v56 = vpop.permute.xlu1 %573 }
 0x222   :  { %vm1020_vm9 = vcmp.ne.f32.partialorder %v574_v56, 0.0 }
 0x223   :  { %v1615_v59 = vrot.slane %v1614_v39, 1  ;;  %v1404_v60 = vsel %vm1020_vm9, %v116_v48, 0.0  ;;  %v1819_v48 = vsub.f32 1.0, %v1818_v42 }
 0x224   :  { %v1617_v25 = vsel %vm25_vm1, %v1404_v60, 0.0  ;;  %v1828_v60 = vand.u32 2147483648, %v1816_v31 }
 0x225   :  { %v1616_v36 = vadd.f32 %v1615_v59, %v1614_v39  ;;  %v1619_v61 = vadd.f32 %v1618_v57, %v1617_v25  ;;  %v1820_v56 = vmul.f32 %v2007_v47, %v1819_v48  ;;  %v2036_v57 = vmov 0  }
 0x226   :  { %1967 = vset.pattern.permute.xlu2 %v2112_v11  ;;  %2004 = vset.pattern.permute.xlu0 %v2036_v57  ;;  %v1826_v59 = vand.u32 2147483647, %v1816_v31  ;;  %v127_v31 = vld [vmem:[%s3116_s2 + $0x258] sm:$0xff] }
 0x227   :  { %1966 = vset.pattern.permute.xlu1 %v2097_v8  ;;  %v2682_v40 = vsel %vm1777_vm10, %v1616_v36, %v2590_v30  ;;  %v118_v30 = vld [vmem:[%s3116_s2 + $0x210] sm:$0xff]  ;;  %v1821_v25 = vadd.f32 %v2007_v47, %v1820_v56  ;;  %v1829_v36 = vor.u32 1.1754944e-38, %v1828_v60 }
 0x228   :  { %v610_v23 = vpop.permute.xlu2 %609  ;;  %vm1827_vm4 = vcmp.eq.f32.partialorder %v1826_v59, 8.507059e+37 }
 0x229   :  { %vm1026_vm14 = vcmp.ne.f32.partialorder %v610_v23, 0.0  ;;  %v1825_v62 = vsel %vm1824_vm3, %v2007_v47, %v1821_v25  ;;  %v126_v23 = vld [vmem:[%s3116_s2 + $0x250] sm:$0xff] }
 0x22a   :  { %v1410_v63 = vsel %vm1026_vm14, %v122_v21, 0.0  ;;  %v1830_v28 = vsel %vm1827_vm4, %v1829_v36, %v1825_v62  ;;  %v130_v36 = vld [vmem:[%s3116_s2 + $0x270] sm:$0xff] }
 0x22b   :  { %v1628_v33 = vsel %vm25_vm1, %v1410_v63, 0.0  ;;  %1834 = vperm.xlu0 %2004, %v1830_v28   ;;  %v131_v28 = vld [vmem:[%s3116_s2 + $0x278] sm:$0xff] }
 0x22e   :  { %700 = vperm.xlu2 %1967, %v2217_v32  }
 0x22f   :  { %694 = vperm.xlu1 %1966, %v2217_v32  }
 0x231   :  { %v586_v53 = vpop.permute.xlu1 %585 }
 0x232   :  { %vm1022_vm13 = vcmp.ne.f32.partialorder %v586_v53, 0.0  ;;  %v123_v53 = vld [vmem:[%s3116_s2 + $0x238] sm:$0xff] }
 0x233   :  { %v1406_v55 = vsel %vm1022_vm13, %v118_v30, 0.0  ;;  %v125_v30 = vld [vmem:[%s3116_s2 + $0x248] sm:$0xff] }
 0x234   :  { %v1620_v52 = vsel %vm25_vm1, %v1406_v55, 0.0  ;;  %v1413_v55 = vsel %vm1029_vm6, %v125_v30, 0.0 }
 0x235   :  { %v1621_v38 = vadd.f32 %v1620_v52, %v1619_v61 }
 0x236   :  { %1969 = vset.pattern.permute.xlu2 %v2103_v9 }
 0x237   :  { %v1623_v37 = vadd.f32 %v1622_v35, %v1621_v38  ;;  %1968 = vset.pattern.permute.xlu1 %v2109_v10 }
 0x238   :  { %v622_v61 = vpop.permute.xlu2 %621 }
 0x239   :  { %v1625_v26 = vadd.f32 %v1624_v7, %v1623_v37  ;;  %vm1028_vm5 = vcmp.ne.f32.partialorder %v622_v61, 0.0  ;;  %v1634_v37 = vsel %vm25_vm1, %v1413_v55, 0.0 }
 0x23a   :  { %v1412_v51 = vsel %vm1028_vm5, %v124_v46, 0.0 }
 0x23b   :  { %v1632_v38 = vsel %vm25_vm1, %v1412_v51, 0.0 }
 0x23e   :  { %712 = vperm.xlu2 %1969, %v2217_v32  }
 0x23f   :  { %706 = vperm.xlu1 %1968, %v2217_v32  }
 0x241   :  { %v604_v45 = vpop.permute.xlu1 %603 }
 0x242   :  { %vm1025_vm15 = vcmp.ne.f32.partialorder %v604_v45, 0.0 }
 0x243   :  { %v1409_v24 = vsel %vm1025_vm15, %v121_v58, 0.0 }
 0x244   :  { %v1626_v18 = vsel %vm25_vm1, %v1409_v24, 0.0 }
 0x245   :  { %v1627_v50 = vadd.f32 %v1626_v18, %v1625_v26  ;;  %v2742_v18 = vpop.permute.xlu0 %748 }
 0x246   :  { %1971 = vset.pattern.permute.xlu2 %v2136_v15 }
 0x247   :  { %v1629_v39 = vadd.f32 %v1628_v33, %v1627_v50  ;;  %1970 = vset.pattern.permute.xlu1 %v2139_v16  ;;  %v129_v33 = vld [vmem:[%s3116_s2 + $0x268] sm:$0xff]  ;;  %v128_v50 = vld [vmem:[%s3116_s2 + $0x260] sm:$0xff] }
 0x248   :  { %v640_v22 = vpop.permute.xlu2 %639 }
 0x249   :  { %vm1031_vm8 = vcmp.ne.f32.partialorder %v640_v22, 0.0 }
 0x24a   :  { %v1415_v58 = vsel %vm1031_vm8, %v127_v31, 0.0  ;;  %vm1044_vm8 = vcmp.ne.f32.partialorder %v2486_v0, 0.0 }
 0x24b   :  { %v1638_v63 = vsel %vm25_vm1, %v1415_v58, 0.0 }
 0x24d   :  { %v658_v25 = vpop.permute.xlu0 %657 }
 0x24e   :  { %730 = vperm.xlu2 %1971, %v2217_v32   ;;  %vm1034_vm12 = vcmp.ne.f32.partialorder %v658_v25, 0.0 }
 0x24f   :  { %724 = vperm.xlu1 %1970, %v2217_v32   ;;  %v1418_v61 = vsel %vm1034_vm12, %v130_v36, 0.0 }
 0x250   :  { %v1644_v62 = vsel %vm25_vm1, %v1418_v61, 0.0  ;;  %v139_v61 = vld [vmem:[%s3116_s2 + $0x2b8] sm:$0xff] }
 0x251   :  { %v616_v6 = vpop.permute.xlu1 %615 }
 0x252   :  { %vm1027_vm7 = vcmp.ne.f32.partialorder %v616_v6, 0.0 }
 0x253   :  { %v1411_v52 = vsel %vm1027_vm7, %v123_v53, 0.0 }
 0x254   :  { %v1630_v35 = vsel %vm25_vm1, %v1411_v52, 0.0 }
 0x255   :  { %v1631_v7 = vadd.f32 %v1630_v35, %v1629_v39 }
 0x256   :  { %1973 = vset.pattern.permute.xlu2 %v2080_v4 }
 0x257   :  { %v1633_v26 = vadd.f32 %v1632_v38, %v1631_v7  ;;  %1972 = vset.pattern.permute.xlu1 %v2074_v2  ;;  %v132_v7 = vld [vmem:[%s3116_s2 + $0x280] sm:$0xff] }
 0x258   :  { %v652_v42 = vpop.permute.xlu2 %651 }
 0x259   :  { %v1635_v54 = vadd.f32 %v1634_v37, %v1633_v26  ;;  %vm1033_vm10 = vcmp.ne.f32.partialorder %v652_v42, 0.0  ;;  %v134_v37 = vld [vmem:[%s3116_s2 + $0x290] sm:$0xff] }
 0x25a   :  { %v1417_v39 = vsel %vm1033_vm10, %v129_v33, 0.0 }
 0x25b   :  { %v1642_v57 = vsel %vm25_vm1, %v1417_v39, 0.0  ;;  %v136_v39 = vld [vmem:[%s3116_s2 + $0x2a0] sm:$0xff] }
 0x25e   :  { %773 = vperm.xlu2 %1973, %v2255_v44  }
 0x25f   :  { %767 = vperm.xlu1 %1972, %v2255_v44  }
 0x261   :  { %v634_v21 = vpop.permute.xlu1 %633 }
 0x262   :  { %vm1030_vm9 = vcmp.ne.f32.partialorder %v634_v21, 0.0 }
 0x263   :  { %v1414_v45 = vsel %vm1030_vm9, %v126_v23, 0.0 }
 0x264   :  { %v1636_v2 = vsel %vm25_vm1, %v1414_v45, 0.0 }
 0x265   :  { %v1637_v47 = vadd.f32 %v1636_v2, %v1635_v54  ;;  %v133_v54 = vld [vmem:[%s3116_s2 + $0x288] sm:$0xff] }
 0x266   :  { %1976 = vset.pattern.permute.xlu2 %v2083_v5 }
 0x267   :  { %v1639_v24 = vadd.f32 %v1638_v63, %v1637_v47  ;;  %1975 = vset.pattern.permute.xlu1 %v2080_v4 }
 0x268   :  { %v671_v30 = vpop.permute.xlu2 %670 }
 0x269   :  { %vm1036_vm14 = vcmp.ne.f32.partialorder %v671_v30, 0.0 }
 0x26a   :  { %v1420_v31 = vsel %vm1036_vm14, %v132_v7, 0.0 }
 0x26b   :  { %v1654_v63 = vsel %vm25_vm1, %v1420_v31, 0.0  ;;  %v149_v31 = vld [vmem:[%s3116_s2 + $0x308] sm:$0xff] }
 0x26e   :  { %779 = vperm.xlu2 %1976, %v2255_v44  }
 0x26f   :  { %870 = vperm.xlu1 %1975, %v2202_v27  }
 0x271   :  { %v646_v48 = vpop.permute.xlu1 %645 }
 0x272   :  { %vm1032_vm11 = vcmp.ne.f32.partialorder %v646_v48, 0.0 }
 0x273   :  { %v1416_v4 = vsel %vm1032_vm11, %v128_v50, 0.0 }
 0x274   :  { %v1640_v56 = vsel %vm25_vm1, %v1416_v4, 0.0 }
 0x275   :  { %v1641_v59 = vadd.f32 %v1640_v56, %v1639_v24 }
 0x276   :  { %1978 = vset.pattern.permute.xlu2 %v2077_v3 }
 0x277   :  { %v1643_v60 = vadd.f32 %v1642_v57, %v1641_v59  ;;  %1977 = vset.pattern.permute.xlu1 %v2083_v5 }
 0x278   :  { %v683_v35 = vpop.permute.xlu2 %682 }
 0x279   :  { %v1645_v3 = vadd.f32 %v1644_v62, %v1643_v60  ;;  %vm1038_vm15 = vcmp.ne.f32.partialorder %v683_v35, 0.0  ;;  %v138_v62 = vld [vmem:[%s3116_s2 + $0x2b0] sm:$0xff] }
 0x27a   :  { %v1422_v21 = vsel %vm1038_vm15, %v134_v37, 0.0  ;;  %vm1068_vm15 = vcmp.ne.f32.partialorder %v2437_v1, 0.0 }
 0x27b   :  { %v1657_v14 = vsel %vm25_vm1, %v1422_v21, 0.0  ;;  %v150_v21 = vld [vmem:[%s3116_s2 + $0x310] sm:$0xff] }
 0x27e   :  { %785 = vperm.xlu2 %1978, %v2255_v44  }
 0x27f   :  { %876 = vperm.xlu1 %1977, %v2202_v27  }
 0x281   :  { %v664_v46 = vpop.permute.xlu1 %663 }
 0x282   :  { %vm1035_vm13 = vcmp.ne.f32.partialorder %v664_v46, 0.0 }
 0x283   :  { %v1419_v5 = vsel %vm1035_vm13, %v131_v28, 0.0 }
 0x284   :  { %v1646_v53 = vsel %vm25_vm1, %v1419_v5, 0.0 }
 0x285   :  { %v1647_v6 = vadd.f32 %v1646_v53, %v1645_v3 }
 0x286   :  { %1981 = vset.pattern.permute.xlu2 %v2097_v8 }
 0x287   :  { %v1648_v51 = vrot.slane %v1647_v6, 4  ;;  %1980 = vset.pattern.permute.xlu1 %v2097_v8  ;;  %v135_v8 = vld [vmem:[%s3116_s2 + $0x298] sm:$0xff] }
 0x288   :  { %v1423_v58 = vsel %vm1039_vm0, %v135_v8, 0.0  ;;  %v701_v48 = vpop.permute.xlu2 %700 }
 0x289   :  { %v1649_v55 = vadd.f32 %v1648_v51, %v1647_v6  ;;  %v1659_v42 = vsel %vm25_vm1, %v1423_v58, 0.0  ;;  %vm1041_vm4 = vcmp.ne.f32.partialorder %v701_v48, 0.0  ;;  %v140_v51 = vld [vmem:[%s3116_s2 + $0x2c0] sm:$0xff]  ;;  %v151_v48 = vld [vmem:[%s3116_s2 + $0x318] sm:$0xff] }
 0x28b   :  { %v1650_v52 = vrot.slane %v1649_v55, 2 }
 0x28d   :  { %v1651_v38 = vadd.f32 %v1650_v52, %v1649_v55  ;;  %v1428_v55 = vsel %vm1044_vm8, %v140_v51, 0.0  ;;  %v142_v52 = vld [vmem:[%s3116_s2 + $0x2d0] sm:$0xff] }
 0x28e   :  { %888 = vperm.xlu2 %1981, %v2202_v27  }
 0x28f   :  { %v1652_v26 = vrot.slane %v1651_v38, 1  ;;  %791 = vperm.xlu1 %1980, %v2255_v44  }
 0x291   :  { %v1653_v22 = vadd.f32 %v1652_v26, %v1651_v38  ;;  %v677_v23 = vpop.permute.xlu1 %676 }
 0x292   :  { %vm1037_vm3 = vcmp.ne.f32.partialorder %v677_v23, 0.0 }
 0x293   :  { %v1421_v45 = vsel %vm1037_vm3, %v133_v54, 0.0  ;;  %v2784_v2 = vsel %vm1779_vm2, %v1653_v22, %v2682_v40  ;;  %v137_v40 = vld [vmem:[%s3116_s2 + $0x2a8] sm:$0xff]  ;;  %vm1071_vm2 = vcmp.ne.f32.partialorder %v2460_v49, 0.0 }
 0x294   :  { %v1655_v47 = vsel %vm25_vm1, %v1421_v45, 0.0  ;;  %v1425_v56 = vsel %vm1041_vm4, %v137_v40, 0.0 }
 0x295   :  { %v1656_v24 = vadd.f32 %v1655_v47, %v1654_v63  ;;  %v1663_v59 = vsel %vm25_vm1, %v1425_v56, 0.0 }
 0x296   :  { %1983 = vset.pattern.permute.xlu2 %v2112_v11 }
 0x297   :  { %v1658_v33 = vadd.f32 %v1657_v14, %v1656_v24  ;;  %1982 = vset.pattern.permute.xlu1 %v2112_v11 }
 0x298   :  { %v713_v36 = vpop.permute.xlu2 %712 }
 0x299   :  { %v1660_v50 = vadd.f32 %v1659_v42, %v1658_v33  ;;  %vm1043_vm6 = vcmp.ne.f32.partialorder %v713_v36, 0.0 }
 0x29a   :  { %v1427_v46 = vsel %vm1043_vm6, %v139_v61, 0.0  ;;  %v167_v61 = vld [vmem:[%s3116_s2 + $0x398] sm:$0xff] }
 0x29b   :  { %v1667_v5 = vsel %vm25_vm1, %v1427_v46, 0.0  ;;  %v1455_v46 = vsel %vm1071_vm2, %v167_v61, 0.0  ;;  %v153_v61 = vld [vmem:[%s3116_s2 + $0x328] sm:$0xff] }
 0x29c   :  { %v1733_v49 = vsel %vm25_vm1, %v1455_v46, 0.0 }
 0x29e   :  { %894 = vperm.xlu2 %1983, %v2202_v27  }
 0x29f   :  { %797 = vperm.xlu1 %1982, %v2255_v44  }
 0x2a1   :  { %v695_v4 = vpop.permute.xlu1 %694 }
 0x2a2   :  { %vm1040_vm5 = vcmp.ne.f32.partialorder %v695_v4, 0.0  ;;  %v164_v4 = vld [vmem:[%s3116_s2 + $0x380] sm:$0xff] }
 0x2a3   :  { %v1424_v57 = vsel %vm1040_vm5, %v136_v39, 0.0 }
 0x2a4   :  { %v1661_v11 = vsel %vm25_vm1, %v1424_v57, 0.0 }
 0x2a5   :  { %v1662_v60 = vadd.f32 %v1661_v11, %v1660_v50  ;;  %v1452_v11 = vsel %vm1068_vm15, %v164_v4, 0.0 }
 0x2a6   :  { %1986 = vset.pattern.permute.xlu2 %v2103_v9 }
 0x2a7   :  { %v1664_v25 = vadd.f32 %v1663_v59, %v1662_v60  ;;  %1985 = vset.pattern.permute.xlu1 %v2109_v10  ;;  %v1728_v60 = vsel %vm25_vm1, %v1452_v11, 0.0  ;;  %v170_v11 = vld [vmem:[%s3116_s2 + $0x3b0] sm:$0xff] }
 0x2a8   :  { %v731_v6 = vpop.permute.xlu2 %730 }
 0x2a9   :  { %vm1046_vm9 = vcmp.ne.f32.partialorder %v731_v6, 0.0 }
 0x2aa   :  { %v1430_v35 = vsel %vm1046_vm9, %v142_v52, 0.0  ;;  %vm1076_vm9 = vcmp.ne.f32.partialorder %v2495_v29, 0.0  ;;  %v154_v29 = vld [vmem:[%s3116_s2 + $0x330] sm:$0xff] }
 0x2ab   :  { %v1673_v26 = vsel %vm25_vm1, %v1430_v35, 0.0  ;;  %v42_v35 = vld [vmem:[%s3115_s1 + $0x60] sm:$0xff] }
 0x2ae   :  { %809 = vperm.xlu2 %1986, %v2255_v44  }
 0x2af   :  { %900 = vperm.xlu1 %1985, %v2202_v27  }
 0x2b1   :  { %v707_v28 = vpop.permute.xlu1 %706 }
 0x2b2   :  { %vm1042_vm7 = vcmp.ne.f32.partialorder %v707_v28, 0.0  ;;  %v168_v28 = vld [vmem:[%s3116_s2 + $0x3a0] sm:$0xff] }
 0x2b3   :  { %v1426_v3 = vsel %vm1042_vm7, %v138_v62, 0.0 }
 0x2b4   :  { %v1665_v10 = vsel %vm25_vm1, %v1426_v3, 0.0 }
 0x2b5   :  { %v1666_v30 = vadd.f32 %v1665_v10, %v1664_v25 }
 0x2b6   :  { %1988 = vset.pattern.permute.xlu2 %v2124_v13  ;;  %v1669_v13 = vsel %vm25_vm1, %v1428_v55, 0.0  ;;  %v45_v55 = vld [vmem:[%s3115_s1 + $0x78] sm:$0xff] }
 0x2b7   :  { %v1668_v53 = vadd.f32 %v1667_v5, %v1666_v30  ;;  %1987 = vset.pattern.permute.xlu1 %v2103_v9  ;;  %v141_v9 = vld [vmem:[%s3116_s2 + $0x2c8] sm:$0xff]  ;;  %1788 = vmatpush.msra.mxu0 %v45_v55 }
 0x2b8   :  { %v774_v37 = vpop.permute.xlu2 %773 }
 0x2b9   :  { %v1670_v7 = vadd.f32 %v1669_v13, %v1668_v53  ;;  %vm1053_vm11 = vcmp.ne.f32.partialorder %v774_v37, 0.0  ;;  %v44_v13 = vld [vmem:[%s3115_s1 + $0x70] sm:$0xff] }
 0x2ba   :  { %v1437_v58 = vsel %vm1053_vm11, %v149_v31, 0.0  ;;  %1789 = vmatpush.msra.mxu0 %v44_v13  ;;  %v40_v37 = vld [vmem:[%s3115_s1 + $0x50] sm:$0xff]  ;;  %v37_v31 = vld [vmem:[%s3115_s1 + $0x38] sm:$0xff]  ;;  %vm1058_vm11 = vcmp.ne.f32.partialorder %v2477_v41, 0.0 }
 0x2bb   :  { %v1692_v47 = vsel %vm25_vm1, %v1437_v58, 0.0  ;;  %v34_v58 = vld [vmem:[%s3115_s1 + $0x20] sm:$0xff]  ;;  %v1442_v55 = vsel %vm1058_vm11, %v154_v29, 0.0  ;;  %v174_v13 = vld [vmem:[%s3116_s2 + $0x3d0] sm:$0xff]  ;;  %v155_v41 = vld [vmem:[%s3116_s2 + $0x338] sm:$0xff] }
 0x2bc   :  { %v146_v29 = vld [vmem:[%s3116_s2 + $0x2f0] sm:$0xff] }
 0x2be   :  { %815 = vperm.xlu2 %1988, %v2255_v44  }
 0x2bf   :  { %906 = vperm.xlu1 %1987, %v2202_v27  }
 0x2c1   :  { %v725_v38 = vpop.permute.xlu1 %724 }
 0x2c2   :  { %vm1045_vm10 = vcmp.ne.f32.partialorder %v725_v38, 0.0  ;;  %v41_v38 = vld [vmem:[%s3115_s1 + $0x58] sm:$0xff] }
 0x2c3   :  { %v1429_v0 = vsel %vm1045_vm10, %v141_v9, 0.0  ;;  %v43_v9 = vld [vmem:[%s3115_s1 + $0x68] sm:$0xff] }
 0x2c4   :  { %v1671_v8 = vsel %vm25_vm1, %v1429_v0, 0.0  ;;  %1790 = vmatpush.msra.mxu0 %v43_v9  ;;  %v152_v0 = vld [vmem:[%s3116_s2 + $0x320] sm:$0xff] }
 0x2c5   :  { %v1672_v54 = vadd.f32 %v1671_v8, %v1670_v7 }
 0x2c6   :  { %1991 = vset.pattern.permute.xlu2 %v2139_v16  ;;  %1791 = vmatpush.msra.mxu0 %v42_v35 }
 0x2c7   :  { %1990 = vset.pattern.permute.xlu1 %v2139_v16  ;;  %v2833_v22 = vadd.f32 %v1673_v26, %v1672_v54  ;;  %v148_v16 = vld [vmem:[%s3116_s2 + $0x300] sm:$0xff] }
 0x2c8   :  { %v780_v23 = vpop.permute.xlu2 %779  ;;  %1792 = vmatpush.msra.mxu0 %v41_v38  ;;  %v38_v54 = vld [vmem:[%s3115_s1 + $0x40] sm:$0xff] }
 0x2c9   :  { %vm1054_vm12 = vcmp.ne.f32.partialorder %v780_v23, 0.0  ;;  %v36_v23 = vld [vmem:[%s3115_s1 + $0x30] sm:$0xff] }
 0x2ca   :  { %v1438_v45 = vsel %vm1054_vm12, %v150_v21, 0.0  ;;  %1793 = vmatpush.msra.mxu0 %v40_v37  ;;  %v35_v21 = vld [vmem:[%s3115_s1 + $0x28] sm:$0xff]  ;;  %v175_v37 = vld [vmem:[%s3116_s2 + $0x3d8] sm:$0xff] }
 0x2cb   :  { %v1694_v24 = vsel %vm25_vm1, %v1438_v45, 0.0  ;;  %v32_v45 = vld [vmem:[%s3115_s1 + $0x10] sm:$0xff] }
 0x2ce   :  { %918 = vperm.xlu2 %1991, %v2202_v27  }
 0x2cf   :  { %821 = vperm.xlu1 %1990, %v2255_v44  }
 0x2d1   :  { %v768_v63 = vpop.permute.xlu1 %767 }
 0x2d2   :  { %vm1052_vm13 = vcmp.ne.f32.partialorder %v768_v63, 0.0  ;;  %v31_v63 = vld [vmem:[%s3115_s1 + $0x8] sm:$0xff] }
 0x2d3   :  { %v1436_v14 = vsel %vm1052_vm13, %v148_v16, 0.0  ;;  %v33_v16 = vld [vmem:[%s3115_s1 + $0x18] sm:$0xff]  ;;  %vm1078_vm13 = vcmp.ne.f32.partialorder %v2515_v43, 0.0 }
 0x2d4   :  { %v1691_v42 = vsel %vm25_vm1, %v1436_v14, 0.0  ;;  %v2008_v14 = vld [vmem:[%s3114_s0] sm:$0xff] }
 0x2d5   :  { %v1693_v33 = vadd.f32 %v1692_v47, %v1691_v42  ;;  %v30_v47 = vld [vmem:[%s3115_s1] sm:$0xff] }
 0x2d6   :  { %1993 = vset.pattern.permute.xlu2 %v2145_v17 }
 0x2d7   :  { %1992 = vset.pattern.permute.xlu1 %v2136_v15  ;;  %v1695_v50 = vadd.f32 %v1694_v24, %v1693_v33  ;;  %v165_v15 = vld [vmem:[%s3116_s2 + $0x388] sm:$0xff] }
 0x2d8   :  { %v786_v40 = vpop.permute.xlu2 %785 }
 0x2d9   :  { %vm1055_vm14 = vcmp.ne.f32.partialorder %v786_v40, 0.0 }
 0x2da   :  { %v1439_v39 = vsel %vm1055_vm14, %v151_v48, 0.0 }
 0x2db   :  { %v1696_v56 = vsel %vm25_vm1, %v1439_v39, 0.0 }
 0x2dc   :  { %v1697_v57 = vadd.f32 %v1696_v56, %v1695_v50 }
 0x2de   :  { %736 = vperm.xlu2 %1993, %v2217_v32  }
 0x2df   :  { %827 = vperm.xlu1 %1992, %v2255_v44  }
 0x2e1   :  { %v871_v59 = vpop.permute.xlu1 %870 }
 0x2e2   :  { %vm1069_vm0 = vcmp.ne.f32.partialorder %v871_v59, 0.0  ;;  %v171_v59 = vld [vmem:[%s3116_s2 + $0x3b8] sm:$0xff] }
 0x2e3   :  { %v1453_v25 = vsel %vm1069_vm0, %v165_v15, 0.0 }
 0x2e4   :  { %v1729_v36 = vsel %vm25_vm1, %v1453_v25, 0.0 }
 0x2e5   :  { %v1730_v1 = vadd.f32 %v1729_v36, %v1728_v60 }
 0x2e6   :  { %1996 = vset.pattern.permute.xlu2 %v2118_v12 }
 0x2e7   :  { %1995 = vset.pattern.permute.xlu1 %v2145_v17  ;;  %v166_v17 = vld [vmem:[%s3116_s2 + $0x390] sm:$0xff] }
 0x2e8   :  { %v889_v62 = vpop.permute.xlu2 %888 }
 0x2e9   :  { %vm1072_vm3 = vcmp.ne.f32.partialorder %v889_v62, 0.0 }
 0x2ea   :  { %v1456_v10 = vsel %vm1072_vm3, %v168_v28, 0.0 }
 0x2eb   :  { %v1735_v6 = vsel %vm25_vm1, %v1456_v10, 0.0 }
 0x2ee   :  { %742 = vperm.xlu2 %1996, %v2217_v32  }
 0x2ef   :  { %833 = vperm.xlu1 %1995, %v2255_v44  }
 0x2f1   :  { %v877_v3 = vpop.permute.xlu1 %876 }
 0x2f2   :  { %vm1070_vm4 = vcmp.ne.f32.partialorder %v877_v3, 0.0 }
 0x2f3   :  { %v1454_v5 = vsel %vm1070_vm4, %v166_v17, 0.0 }
 0x2f4   :  { %v1731_v30 = vsel %vm25_vm1, %v1454_v5, 0.0 }
 0x2f5   :  { %v1732_v53 = vadd.f32 %v1731_v30, %v1730_v1  ;;  %v172_v1 = vld [vmem:[%s3116_s2 + $0x3c0] sm:$0xff]  ;;  %v173_v30 = vld [vmem:[%s3116_s2 + $0x3c8] sm:$0xff] }
 0x2f6   :  { %839 = vperm.xlu2 %1996, %v2255_v44   ;;  %v1460_v10 = vsel %vm1076_vm9, %v172_v1, 0.0  ;;  %vm1049_vm9 = vcmp.ne.f32.partialorder %v2742_v18, 0.0  ;;  %v145_v1 = vld [vmem:[%s3116_s2 + $0x2e8] sm:$0xff] }
 0x2f7   :  { %v1734_v51 = vadd.f32 %v1733_v49, %v1732_v53  ;;  %930 = vperm.xlu1 %1995, %v2202_v27  }
 0x2f9   :  { %v2888_v52 = vadd.f32 %v1735_v6, %v1734_v51  ;;  %v1743_v6 = vsel %vm25_vm1, %v1460_v10, 0.0  ;;  %v179_v10 = vld [vmem:[%s3116_s2 + $0x3f8] sm:$0xff] }
 0x2fe   :  { %1999 = vset.pattern.permute.xlu2 %v2222_v34 }
 0x2ff   :  { %1998 = vset.pattern.permute.xlu1 %v2118_v12  ;;  %v39_v12 = vld [vmem:[%s3115_s1 + $0x48] sm:$0xff] }
 0x300   :  { %1794 = vmatpush.msra.mxu0 %v39_v12 }
 0x301   :  { %v792_v7 = vpop.permute.xlu1 %791 }
 0x302   :  { %vm1056_vm5 = vcmp.ne.f32.partialorder %v792_v7, 0.0  ;;  %1795 = vmatpush.msra.mxu0 %v38_v54  ;;  %v176_v54 = vld [vmem:[%s3116_s2 + $0x3e0] sm:$0xff] }
 0x303   :  { %v1440_v26 = vsel %vm1056_vm5, %v152_v0, 0.0  ;;  %v1702_v0 = vsel %vm25_vm1, %v1442_v55, 0.0 }
 0x304   :  { %v1698_v34 = vsel %vm25_vm1, %v1440_v26, 0.0  ;;  %1796 = vmatpush.msra.mxu0 %v37_v31  ;;  %v1462_v26 = vsel %vm1078_vm13, %v174_v13, 0.0 }
 0x305   :  { %v2914_v8 = vadd.f32 %v1698_v34, %v1697_v57  ;;  %v156_v34 = vld [vmem:[%s3116_s2 + $0x340] sm:$0xff] }
 0x306   :  { %845 = vperm.xlu2 %1999, %v2255_v44   ;;  %1797 = vmatpush.msra.mxu0 %v36_v23 }
 0x307   :  { %936 = vperm.xlu1 %1998, %v2202_v27  }
 0x308   :  { %1798 = vmatpush.msra.mxu0 %v35_v21 }
 0x30a   :  { %1799 = vmatpush.msra.mxu0 %v34_v58  ;;  %v1747_v58 = vsel %vm25_vm1, %v1462_v26, 0.0 }
 0x30c   :  { %1800 = vmatpush.msra.mxu0 %v33_v16 }
 0x30e   :  { %942 = vperm.xlu2 %1999, %v2202_v27   ;;  %1801 = vmatpush.msra.mxu0 %v32_v45 }
 0x30f   :  { %2000 = vset.pattern.permute.xlu1 %v2163_v20 }
 0x310   :  { %1802 = vmatpush.msra.mxu0 %v31_v63 }
 0x311   :  { %v798_v33 = vpop.permute.xlu1 %797 }
 0x312   :  { %1803 = vmatpush.msra.mxu0 %v30_v47  ;;  %vm1057_vm10 = vcmp.ne.f32.partialorder %v798_v33, 0.0  ;;  %v157_v47 = vld [vmem:[%s3116_s2 + $0x348] sm:$0xff] }
 0x313   :  { %1804 = vmatmul.f32.vlgmr.msra.gmra.mxu0 %v2008_v14  ;;  %v1441_v5 = vsel %vm1057_vm10, %v153_v61, 0.0 }
 0x314   :  { %v1700_v51 = vsel %vm25_vm1, %v1441_v5, 0.0 }
 0x315   :  { %v1701_v9 = vadd.f32 %v1700_v51, %v2914_v8  ;;  %v143_v8 = vld [vmem:[%s3116_s2 + $0x2d8] sm:$0xff] }
 0x316   :  { %2002 = vset.pattern.permute.xlu2 %v2163_v20  ;;  %v895_v20 = vpop.permute.xlu2 %894 }
 0x317   :  { %754 = vperm.xlu1 %2000, %v2217_v32   ;;  %vm1073_vm6 = vcmp.ne.f32.partialorder %v895_v20, 0.0  ;;  %v1703_v31 = vadd.f32 %v1702_v0, %v1701_v9  ;;  %v144_v20 = vld [vmem:[%s3116_s2 + $0x2e0] sm:$0xff] }
 0x31e   :  { %948 = vperm.xlu2 %2002, %v2202_v27   ;;  %v810_v24 = vpop.permute.xlu2 %809 }
 0x31f   :  { %2001 = vset.pattern.permute.xlu1 %v2160_v19  ;;  %vm1059_vm14 = vcmp.ne.f32.partialorder %v810_v24, 0.0 }
 0x320   :  { %v1443_v43 = vsel %vm1059_vm14, %v155_v41, 0.0 }
 0x321   :  { %v901_v48 = vpop.permute.xlu1 %900  ;;  %v1704_v16 = vsel %vm25_vm1, %v1443_v43, 0.0  ;;  %v147_v43 = vld [vmem:[%s3116_s2 + $0x2f8] sm:$0xff] }
 0x322   :  { %vm1074_vm7 = vcmp.ne.f32.partialorder %v901_v48, 0.0  ;;  %v1705_v33 = vadd.f32 %v1704_v16, %v1703_v31  ;;  %v1838_v31 = vld [vmem:[%s3117_s3] sm:$0xff] }
 0x323   :  { %v1458_v60 = vsel %vm1074_vm7, %v170_v11, 0.0  ;;  %v159_v11 = vld [vmem:[%s3116_s2 + $0x358] sm:$0xff] }
 0x324   :  { %v1739_v62 = vsel %vm25_vm1, %v1458_v60, 0.0 }
 0x326   :  { %2003 = vset.pattern.permute.xlu2 %v2160_v19  ;;  %v2958_v42 = vpop.permute.xlu2 %815 }
 0x327   :  { %760 = vperm.xlu1 %2001, %v2217_v32   ;;  %vm1060_vm0 = vcmp.ne.f32.partialorder %v2958_v42, 0.0  ;;  %v177_v42 = vld [vmem:[%s3116_s2 + $0x3e8] sm:$0xff] }
 0x328   :  { %v1444_v45 = vsel %vm1060_vm0, %v156_v34, 0.0 }
 0x32e   :  { %954 = vperm.xlu2 %2003, %v2202_v27   ;;  %v919_v50 = vpop.permute.xlu2 %918 }
 0x32f   :  { %857 = vperm.xlu1 %2001, %v2255_v44   ;;  %v169_v44 = vld [vmem:[%s3116_s2 + $0x3a8] sm:$0xff]  ;;  %vm1077_vm12 = vcmp.ne.f32.partialorder %v919_v50, 0.0  ;;  %v158_v50 = vld [vmem:[%s3116_s2 + $0x350] sm:$0xff] }
 0x330   :  { %v1457_v15 = vsel %vm1073_vm6, %v169_v44, 0.0 }
 0x331   :  { %v907_v40 = vpop.permute.xlu1 %906  ;;  %v1737_v25 = vsel %vm25_vm1, %v1457_v15, 0.0 }
 0x332   :  { %vm1075_vm8 = vcmp.ne.f32.partialorder %v907_v40, 0.0  ;;  %v1738_v28 = vadd.f32 %v1737_v25, %v2888_v52  ;;  %v1461_v52 = vsel %vm1077_vm12, %v173_v30, 0.0  ;;  %v1706_v40 = vsel %vm25_vm1, %v1444_v45, 0.0  ;;  %v178_v25 = vld [vmem:[%s3116_s2 + $0x3f0] sm:$0xff] }
 0x333   :  { %v1459_v36 = vsel %vm1075_vm8, %v171_v59, 0.0  ;;  %v1745_v7 = vsel %vm25_vm1, %v1461_v52, 0.0  ;;  %v1707_v61 = vadd.f32 %v1706_v40, %v1705_v33  ;;  %v1433_v30 = vsel %vm1049_vm9, %v145_v1, 0.0 }
 0x334   :  { %v1741_v3 = vsel %vm25_vm1, %v1459_v36, 0.0  ;;  %v1740_v49 = vadd.f32 %v1739_v62, %v1738_v28 }
 0x336   :  { %v1742_v53 = vadd.f32 %v1741_v3, %v1740_v49  ;;  %v160_v49 = vld [vmem:[%s3116_s2 + $0x360] sm:$0xff] }
 0x338   :  { %v2960_v39 = vpop.permute.xlu2 %736  ;;  %v1744_v35 = vadd.f32 %v1743_v6, %v1742_v53 }
 0x339   :  { %vm1047_vm2 = vcmp.ne.f32.partialorder %v2960_v39, 0.0 }
 0x33a   :  { %v1746_v21 = vadd.f32 %v1745_v7, %v1744_v35  ;;  %v1431_v63 = vsel %vm1047_vm2, %v143_v8, 0.0  ;;  %v1679_v35 = vsel %vm25_vm1, %v1433_v30, 0.0  ;;  %v1808_v30 = vld [vmem:[#allocation2] sm:$0xff] }
 0x33b   :  { %v1675_v39 = vsel %vm25_vm1, %v1431_v63, 0.0 }
 0x33c   :  { %v1748_v48 = vadd.f32 %v1747_v58, %v1746_v21  ;;  %v1676_v62 = vadd.f32 %v1675_v39, %v2833_v22 }
 0x341   :  { %v2962_v4 = vpop.permute.xlu1 %821 }
 0x342   :  { %vm1061_vm4 = vcmp.ne.f32.partialorder %v2962_v4, 0.0 }
 0x343   :  { %v1445_v4 = vsel %vm1061_vm4, %v157_v47, 0.0  ;;  %vm1783_vm4 = vcmask 1046534  }
 0x348   :  { %v2964_v56 = vpop.permute.xlu2 %742 }
 0x349   :  { %vm1048_vm5 = vcmp.ne.f32.partialorder %v2964_v56, 0.0 }
 0x34a   :  { %v1432_v44 = vsel %vm1048_vm5, %v144_v20, 0.0  ;;  %vm1785_vm5 = vcmask 1047559  }
 0x350   :  { %v2968_v32 = vpop.permute.xlu2 %839 }
 0x351   :  { %v2966_v19 = vpop.permute.xlu1 %827  ;;  %vm1064_vm12 = vcmp.ne.f32.partialorder %v2968_v32, 0.0 }
 0x352   :  { %vm1062_vm7 = vcmp.ne.f32.partialorder %v2966_v19, 0.0  ;;  %v1448_v41 = vsel %vm1064_vm12, %v160_v49, 0.0 }
 0x353   :  { %v1446_v19 = vsel %vm1062_vm7, %v158_v50, 0.0  ;;  %v1714_v7 = vsel %vm25_vm1, %v1448_v41, 0.0 }
 0x354   :  { %v1710_v5 = vsel %vm25_vm1, %v1446_v19, 0.0 }
 0x360   :  { %v2975_v57 = vpop.permute.xlu2 %845 }
 0x361   :  { %v2970_v27 = vpop.permute.xlu1 %833  ;;  %vm1065_vm14 = vcmp.ne.f32.partialorder %v2975_v57, 0.0  ;;  %v1839_v57 = vld [vmem:[%s3117_s3 + $0x8] sm:$0xff] }
 0x362   :  { %vm1063_vm8 = vcmp.ne.f32.partialorder %v2970_v27, 0.0  ;;  %v1708_v27 = vsel %vm25_vm1, %v1445_v4, 0.0  ;;  %1861 = vmatpush.msra.mxu1 %v1839_v57 }
 0x363   :  { %v1709_v53 = vadd.f32 %v1708_v27, %v1707_v61 }
 0x364   :  { %1862 = vmatpush.msra.mxu1 %v1838_v31 }
 0x365   :  { %v1711_v13 = vadd.f32 %v1710_v5, %v1709_v53 }
 0x368   :  { %v943_v46 = vpop.permute.xlu2 %942 }
 0x369   :  { %v931_v17 = vpop.permute.xlu1 %930  ;;  %vm1081_vm6 = vcmp.ne.f32.partialorder %v943_v46, 0.0  ;;  %v1447_v46 = vsel %vm1063_vm8, %v159_v11, 0.0 }
 0x36a   :  { %vm1079_vm15 = vcmp.ne.f32.partialorder %v931_v17, 0.0  ;;  %v1465_v59 = vsel %vm1081_vm6, %v177_v42, 0.0  ;;  %v1677_v17 = vsel %vm25_vm1, %v1432_v44, 0.0  ;;  %v1712_v51 = vsel %vm25_vm1, %v1447_v46, 0.0 }
 0x36b   :  { %v1463_v23 = vsel %vm1079_vm15, %v175_v37, 0.0  ;;  %v1753_v3 = vsel %vm25_vm1, %v1465_v59, 0.0  ;;  %v1678_v6 = vadd.f32 %v1677_v17, %v1676_v62  ;;  %v1713_v18 = vadd.f32 %v1712_v51, %v1711_v13 }
 0x36c   :  { %v1749_v24 = vsel %vm25_vm1, %v1463_v23, 0.0  ;;  %v162_v23 = vld [vmem:[%s3116_s2 + $0x370] sm:$0xff] }
 0x36d   :  { %v1750_v15 = vadd.f32 %v1749_v24, %v1748_v48  ;;  %v1680_v8 = vadd.f32 %v1679_v35, %v1678_v6  ;;  %v1715_v58 = vadd.f32 %v1714_v7, %v1713_v18  ;;  %v163_v48 = vld [vmem:[%s3116_s2 + $0x378] sm:$0xff] }
 0x378   :  { %v949_v12 = vpop.permute.xlu2 %948 }
 0x379   :  { %v937_v38 = vpop.permute.xlu1 %936  ;;  %vm1082_vm10 = vcmp.ne.f32.partialorder %v949_v12, 0.0  ;;  %v852_v12 = vpop.permute.xlu0 %851 }
 0x37a   :  { %vm1080_vm3 = vcmp.ne.f32.partialorder %v937_v38, 0.0  ;;  %v1466_v22 = vsel %vm1082_vm10, %v178_v25, 0.0  ;;  %v161_v38 = vld [vmem:[%s3116_s2 + $0x368] sm:$0xff]  ;;  %vm1066_vm15 = vcmp.ne.f32.partialorder %v852_v12, 0.0 }
 0x37b   :  { %v1464_v14 = vsel %vm1080_vm3, %v176_v54, 0.0  ;;  %v1755_v9 = vsel %vm25_vm1, %v1466_v22, 0.0  ;;  %v1449_v34 = vsel %vm1065_vm14, %v161_v38, 0.0  ;;  %vm1781_vm3 = vcmask 1045509  }
 0x37c   :  { %v1751_v56 = vsel %vm25_vm1, %v1464_v14, 0.0  ;;  %v1716_v63 = vsel %vm25_vm1, %v1449_v34, 0.0  ;;  %v1450_v14 = vsel %vm1066_vm15, %v162_v23, 0.0 }
 0x37d   :  { %v1752_v28 = vadd.f32 %v1751_v56, %v1750_v15  ;;  %v1717_v42 = vadd.f32 %v1716_v63, %v1715_v58  ;;  %v1718_v50 = vsel %vm25_vm1, %v1450_v14, 0.0 }
 0x37f   :  { %v1754_v55 = vadd.f32 %v1753_v3, %v1752_v28  ;;  %v1719_v11 = vadd.f32 %v1718_v50, %v1717_v42 }
 0x381   :  { %v1756_v37 = vadd.f32 %v1755_v9, %v1754_v55  ;;  %v1835_v51 = vpop.permute.xlu0 %1834 }
 0x388   :  { %v955_v60 = vpop.permute.xlu2 %954 }
 0x389   :  { %v755_v36 = vpop.permute.xlu1 %754  ;;  %vm1083_vm11 = vcmp.ne.f32.partialorder %v955_v60, 0.0 }
 0x38a   :  { %vm1050_vm13 = vcmp.ne.f32.partialorder %v755_v36, 0.0  ;;  %v1467_v52 = vsel %vm1083_vm11, %v179_v10, 0.0 }
 0x38b   :  { %v1434_v32 = vsel %vm1050_vm13, %v146_v29, 0.0  ;;  %v1757_v0 = vsel %vm25_vm1, %v1467_v52, 0.0 }
 0x38c   :  { %v1681_v26 = vsel %vm25_vm1, %v1434_v32, 0.0  ;;  %v1758_v21 = vadd.f32 %v1757_v0, %v1756_v37 }
 0x38d   :  { %v1682_v16 = vadd.f32 %v1681_v26, %v1680_v8 }
 0x38e   :  { %v1759_v24 = vrot.slane %v1758_v21, 4 }
 0x390   :  { %v1760_v4 = vadd.f32 %v1759_v24, %v1758_v21  ;;  %v1805_v49 = vpop.f32.mrf.mxu0 }
 0x392   :  { %v1761_v19 = vrot.slane %v1760_v4, 2 }
 0x394   :  { %v1762_v62 = vadd.f32 %v1761_v19, %v1760_v4 }
 0x396   :  { %v1763_v46 = vrot.slane %v1762_v62, 1 }
 0x398   :  { %v1764_v5 = vadd.f32 %v1763_v46, %v1762_v62 }
 0x399   :  { %v761_v54 = vpop.permute.xlu1 %760 }
 0x39a   :  { %vm1051_vm0 = vcmp.ne.f32.partialorder %v761_v54, 0.0 }
 0x39b   :  { %v1435_v45 = vsel %vm1051_vm0, %v147_v43, 0.0 }
 0x39c   :  { %v1683_v47 = vsel %vm25_vm1, %v1435_v45, 0.0 }
 0x39d   :  { %v1684_v20 = vadd.f32 %v1683_v47, %v1682_v16 }
 0x39f   :  { %v1685_v33 = vrot.slane %v1684_v20, 4 }
 0x3a1   :  { %v1686_v40 = vadd.f32 %v1685_v33, %v1684_v20  ;;  %v858_v39 = vpop.permute.xlu1 %857 }
 0x3a2   :  { %vm1067_vm2 = vcmp.ne.f32.partialorder %v858_v39, 0.0 }
 0x3a3   :  { %v1687_v56 = vrot.slane %v1686_v40, 2  ;;  %v1451_v44 = vsel %vm1067_vm2, %v163_v48, 0.0 }
 0x3a4   :  { %v1720_v15 = vsel %vm25_vm1, %v1451_v44, 0.0 }
 0x3a5   :  { %v1688_v59 = vadd.f32 %v1687_v56, %v1686_v40  ;;  %v1721_v60 = vadd.f32 %v1720_v15, %v1719_v11 }
 0x3a7   :  { %v1689_v25 = vrot.slane %v1688_v59, 1  ;;  %v1722_v36 = vrot.slane %v1721_v60, 4 }
 0x3a9   :  { %v1690_v1 = vadd.f32 %v1689_v25, %v1688_v59  ;;  %v1723_v61 = vadd.f32 %v1722_v36, %v1721_v60 }
 0x3ab   :  { %v1724_v27 = vrot.slane %v1723_v61, 2  ;;  %v1782_v28 = vsel %vm1781_vm3, %v1690_v1, %v2784_v2  ;;  %v2005_v2 = vld [vmem:[%s3118_s4] ss:$0 sm:$0xff] }
 0x3ad   :  { %v1725_v17 = vadd.f32 %v1724_v27, %v1723_v61 }
 0x3af   :  { %v1726_v3 = vrot.slane %v1725_v17, 1 }
 0x3b1   :  { %v1727_v10 = vadd.f32 %v1726_v3, %v1725_v17 }
 0x3b3   :  { %v1784_v22 = vsel %vm1783_vm4, %v1727_v10, %v1782_v28 }
 0x3b4   :  { %v1786_v29 = vsel %vm1785_vm5, %v1764_v5, %v1784_v22 }
 0x3b5   :  { %v1806_v53 = vadd.f32 %v1805_v49, %v1786_v29 }
 0x3b7   :  { %v1809_v6 = vadd.f32 %v1808_v30, %v1806_v53 }
 0x3b9   :  { %1810 = vst.msk [vmem:[#allocation2] sm:$0xff] %vm25_vm1, %v1809_v6 }
 0x3c0   :  { %v1815_v55 = vld [vmem:[#allocation2] sm:$0xff] }
 0x3c1   :  { %v1837_v52 = vmul.f32 %v1835_v51, %v1815_v55 }
 0x3c3   :  { %1884 = vmatmul.msk.f32.vlgmr.msra.gmra.mxu1 %vm25_vm1, %v1837_v52 }
 0x440   :  { %v1864_v13 = vpop.f32.mrf.mxu1 }
 0x441   :  { %v1865_v41 = vadd.f32 %v2005_v2, %v1864_v13 }
 0x443   :  { %1867 = vst [vmem:[#allocation4] sm:$0xff] %v1865_v41 }
 0x444   :  { %1878 = dma.vmem_to_hbm [thread:$0]  %s1874_s9, 128, %s1876_s12, [#allocation5]  }
 0x445   :  { %2033 = dma.done.wait [#allocation5], 128  }
 0x446   :  { %2034 = vsyncadd [#allocation5], 4294967168 }
 0x447   :  { %1883 = vsyncpa [#allocation5], 1 }

</bundles_post_ra>
